<compile_context>
chip_gen: v7x
topology: tpu7x:2x2x1
jax: 0.10.0
libtpu: 0.0.40
codegen_flags: <defaults>
</compile_context>

<pallas_src>
import functools

import jax
import jax.numpy as jnp
from jax.experimental import pallas as pl
from jax.experimental.pallas import tpu as pltpu

LANE = 128   # TPU lane width (feature / K padding target)
SUB = 8      # TPU sublane width (row padding target)


def _r8(x):
    return ((x + SUB - 1) // SUB) * SUB


def _vmem():
    return pl.BlockSpec(memory_space=pltpu.MemorySpace.VMEM)


# ----------------------------------------------------------------------------
# Fused kernel: GNN encoder (both graphs) + task-conditioned relation head
# ----------------------------------------------------------------------------

def _make_fused_kernel(n_gnn_layers, n_extra_layers, n_s, nsp, nqp, embp):
    def kernel(*refs):
        i = 0
        x_ref, a_ref, pool_ref = refs[i:i + 3]; i += 3
        gnn_w = [refs[i + 4 * k: i + 4 * k + 4] for k in range(n_gnn_layers)]
        i += 4 * n_gnn_layers
        t_ref, oh_ref = refs[i:i + 2]; i += 2
        w1s, w1t, b10, w20, b20 = refs[i:i + 5]; i += 5
        extra = [refs[i + 4 * k: i + 4 * k + 4] for k in range(n_extra_layers)]
        i += 4 * n_extra_layers
        ew1, eb1, ew2, eb2, cw, cb = refs[i:i + 6]; i += 6
        s_log_ref, q_logit_ref, hs_ref, hq_ref = refs[i:i + 4]

        def dotb(a, b):
            # bf16 MXU matmul with f32 accumulation
            return jnp.dot(a.astype(jnp.bfloat16), b.astype(jnp.bfloat16),
                           preferred_element_type=jnp.float32)

        # ---- GNN encoder on block-stacked support+query graphs (run once) ----
        a = a_ref[...]
        h = x_ref[...].astype(jnp.float32)
        for li, (w1, b1, w2, b2) in enumerate(gnn_w):
            agg = dotb(a, h)                                   # neighbour agg (self-loop incl.)
            z = jnp.maximum(dotb(agg, w1[...]) + b1[...], 0.0)  # GIN MLP lin1 + ReLU
            h = dotb(z, w2[...]) + b2[...]                      # GIN MLP lin2
            if li < n_gnn_layers - 1:
                h = jnp.maximum(h, 0.0)                         # inter-layer ReLU
        # mean graph pooling (kept f32: exact); rows [0,nsp) support, [nsp,nsp+nqp) query
        pooled = jnp.dot(pool_ref[...], h, preferred_element_type=jnp.float32)
        s_feat = pooled[:nsp]
        q_feat = pooled[nsp:nsp + nqp]

        # ---- relation node MLP layer 0 (implicit concat([feat, task]) via split weights)
        t_contrib = dotb(t_ref[...], w1t[...]) + b10[...]       # [1, E]

        def layer0(feat):
            hh = jnp.maximum(dotb(feat, w1s[...]) + t_contrib, 0.0)
            hh = dotb(hh, w20[...]) + b20[...]
            return jnp.maximum(hh, 0.0)

        hs = layer0(s_feat)                                     # [nsp, E]
        hq = layer0(q_feat)                                     # [nqp, E]
        for (w1, b1, w2, b2) in extra:
            zs = jnp.maximum(dotb(hs, w1[...]) + b1[...], 0.0)
            hs = jnp.maximum(dotb(zs, w2[...]) + b2[...], 0.0)
            zq = jnp.maximum(dotb(hq, w1[...]) + b1[...], 0.0)
            hq = jnp.maximum(dotb(zq, w2[...]) + b2[...], 0.0)

        # ---- edge MLP -> single score per (q,s) pair, support dim on lanes ----
        diff = jnp.abs(hs[None, :, :] - hq[:, None, :])         # [nqp, nsp, E]
        e_in = diff.reshape(nqp * nsp, embp)                    # layout no-op
        ez = jnp.maximum(dotb(e_in, ew1[...]) + eb1[...], 0.0)
        e_out = dotb(ez, ew2[...]) + eb2[...]                   # only lane 0 carries the score
        score = jnp.sum(e_out.reshape(nqp, nsp, embp), axis=-1)  # [nqp, nsp], exact (lanes>0 are 0)

        # masked softmax over supports = one lane-axis reduction on a single vreg
        sup_lane = jax.lax.broadcasted_iota(jnp.int32, (nqp, nsp), 1)
        score = jnp.where(sup_lane < n_s, score, jnp.float32(-1e30))
        m = jnp.max(score, axis=-1, keepdims=True)
        p = jnp.exp(score - m)
        attn = p * pl.reciprocal(jnp.sum(p, axis=-1, keepdims=True), approx=True)

        # class aggregation as a tiny MXU matmul (f32, exact onehot)
        q_neigh = jnp.dot(attn, oh_ref[...], preferred_element_type=jnp.float32)

        # ---- 2D lane-dense outputs; n_q-fold replication is left to the wrapper ----
        q_logit_ref[...] = dotb(hq, cw[...]) + cb[...] + q_neigh   # [nqp, E] (lanes 0..1 valid)
        s_log_ref[...] = dotb(hs, cw[...]) + cb[...]               # [nsp, E]
        hs_ref[...] = hs
        hq_ref[...] = hq
    return kernel


# ----------------------------------------------------------------------------
# GSMeta.forward (exact glue semantics; repeat/unsqueeze/cat done lazily by XLA)
# ----------------------------------------------------------------------------

def gs_meta_forward(params, x_all, a_all, pool_all, s_y, q_y, sampled_task, *,
                    n_s, n_q, nsp, nqp, emb):
    gnn = params["gnn"]
    rel = params["rel"]
    embp = LANE

    # task embedding row + lane-dense support-label one-hot (wrapper glue)
    t_row = jax.lax.dynamic_slice_in_dim(rel["task_emb"], sampled_task, 1, axis=0)
    oh = jax.nn.one_hot(s_y, 2, dtype=jnp.float32)
    s_onehot = jnp.zeros((nsp, embp), jnp.float32).at[:n_s, :2].set(oh)

    ops = [x_all, a_all, pool_all]
    for lp in gnn["layers"]:
        ops += [lp["w1"], lp["b1"], lp["w2"], lp["b2"]]
    ops += [t_row, s_onehot]
    l0 = rel["layer0"]
    ops += [l0["w1s"], l0["w1t"], l0["b1"], l0["w2"], l0["b2"]]
    for lp in rel["node_layers"]:
        ops += [lp["w1"], lp["b1"], lp["w2"], lp["b2"]]
    e = rel["edge"]
    ops += [e["w1"], e["b1"], e["w2"], e["b2"], rel["cls_w"], rel["cls_b"]]

    out_shapes = (
        jax.ShapeDtypeStruct((nsp, embp), jnp.float32),   # s_log (per-support logits)
        jax.ShapeDtypeStruct((nqp, embp), jnp.float32),   # q_logit
        jax.ShapeDtypeStruct((nsp, embp), jnp.float32),   # hs (support node reps)
        jax.ShapeDtypeStruct((nqp, embp), jnp.float32),   # hq (query node reps)
    )
    s_log, q_logit_pad, hs, hq = pl.pallas_call(
        _make_fused_kernel(len(gnn["layers"]), len(rel["node_layers"]),
                           n_s, nsp, nqp, embp),
        out_shape=out_shapes,
        in_specs=[_vmem()] * len(ops),
        out_specs=tuple(_vmem() for _ in out_shapes),
        compiler_params=pltpu.CompilerParams(vmem_limit_bytes=32 * 1024 * 1024),
    )(*ops)

    # torch: s_feat.repeat(n_q,1,1); q_feat.unsqueeze(1); cat(dim=1) -- the
    # query-replicated assembly is left to XLA (lazy broadcast / fused into consumer).
    s_logit = jnp.broadcast_to(s_log[None, :n_s, :2], (n_q, n_s, 2)).reshape(n_q * n_s, 2)
    q_logit = q_logit_pad[:n_q, :2]
    graph_f = jnp.concatenate(
        [jnp.broadcast_to(hs[None, :n_s, :emb], (n_q, n_s, emb)),
         hq[:n_q, None, :emb]], axis=1)
    s_label = jnp.broadcast_to(s_y[None, :], (n_q, n_s)).reshape(-1)
    q_label = q_y
    return s_logit, q_logit, s_label, q_label, graph_f


# ----------------------------------------------------------------------------
# Deterministic parameter / data construction (pre-padded to TPU tile shapes)
# ----------------------------------------------------------------------------

def _dense(key, fan_in, fan_out):
    return (jax.random.normal(key, (fan_in, fan_out), jnp.float32)
            / jnp.sqrt(jnp.float32(fan_in)))


def _padw(w, rows=LANE, cols=LANE, dtype=jnp.bfloat16):
    r, c = w.shape
    return jnp.pad(w, ((0, rows - r), (0, cols - c))).astype(dtype)


def _zero_bias():
    return jnp.zeros((1, LANE), jnp.float32)


def init_params(key, node_dim, emb, mol_layers, rel_layers, edge_hidden, task_num):
    keys = jax.random.split(key, 64)
    ki = iter(range(64))

    gnn_layers = []
    d_in = node_dim
    for _ in range(mol_layers):
        gnn_layers.append({
            "w1": _padw(_dense(keys[next(ki)], d_in, emb)),
            "b1": _zero_bias(),
            "w2": _padw(_dense(keys[next(ki)], emb, emb)),
            "b2": _zero_bias(),
        })
        d_in = emb

    # relation node layer 0: weight over concat([feat, task_emb]) split in two halves
    w1_full = _dense(keys[next(ki)], 2 * emb, emb)
    layer0 = {
        "w1s": _padw(w1_full[:emb]),
        "w1t": _padw(w1_full[emb:]),
        "b1": _zero_bias(),
        "w2": _padw(_dense(keys[next(ki)], emb, emb)),
        "b2": _zero_bias(),
    }
    node_layers = []
    for _ in range(rel_layers - 1):
        node_layers.append({
            "w1": _padw(_dense(keys[next(ki)], emb, emb)),
            "b1": _zero_bias(),
            "w2": _padw(_dense(keys[next(ki)], emb, emb)),
            "b2": _zero_bias(),
        })

    # edge MLP final projection: real weight column / bias only at lane 0,
    # padded lanes exactly zero -> in-kernel lane-sum recovers the scalar score.
    ew2 = _dense(keys[next(ki)], edge_hidden, 1)
    rel = {
        "task_emb": _padw(_dense(keys[next(ki)], task_num, emb), rows=task_num),
        "layer0": layer0,
        "node_layers": node_layers,
        "edge": {
            "w1": _padw(_dense(keys[next(ki)], emb, edge_hidden)),
            "b1": _zero_bias(),
            "w2": _padw(ew2),
            "b2": _zero_bias(),            # real bias (=0) lives at lane 0 only
        },
        "cls_w": _padw(_dense(keys[next(ki)], emb, 2)),
        "cls_b": _zero_bias(),
    }
    return {"gnn": {"layers": gnn_layers}, "rel": rel}


def make_combined_graph_batch(key_s, key_q, n_s_graphs, n_q_graphs, nodes_per_graph,
                              node_dim, nsp, nqp):
    """Synthetic PyG-Batch stand-in for BOTH graph batches, block-stacked:
    dense node features, block-diag adjacency (+I self-loops), stacked mean-pool
    matrix.  Padded nodes are isolated with zero pool weight."""
    def build(key, n_graphs):
        n = n_graphs * nodes_per_graph
        kx, ka = jax.random.split(key)
        x = jax.random.normal(kx, (n, node_dim), jnp.float32)
        batch = jnp.repeat(jnp.arange(n_graphs), nodes_per_graph)
        same = (batch[:, None] == batch[None, :]).astype(jnp.float32)
        rnd = jax.random.uniform(ka, (n, n))
        adj = (rnd < 0.5).astype(jnp.float32)
        adj = jnp.maximum(adj, adj.T) * same
        adj = adj * (1.0 - jnp.eye(n, dtype=jnp.float32))
        a_hat = adj + jnp.eye(n, dtype=jnp.float32)       # GIN self-loop, eps = 0
        pool = (jnp.arange(n_graphs)[:, None] == batch[None, :]).astype(jnp.float32)
        pool = pool / jnp.maximum(pool.sum(axis=1, keepdims=True), 1.0)
        return x, a_hat, pool

    xs, as_, ps = build(key_s, n_s_graphs)
    xq, aq, pq = build(key_q, n_q_graphs)
    ns_n, nq_n = xs.shape[0], xq.shape[0]
    ns_pad, nq_pad = _r8(ns_n), _r8(nq_n)
    n_all = ns_pad + nq_pad

    x_all = jnp.zeros((n_all, LANE), jnp.float32)
    x_all = x_all.at[:ns_n, :node_dim].set(xs)
    x_all = x_all.at[ns_pad:ns_pad + nq_n, :node_dim].set(xq)

    a_all = jnp.zeros((n_all, n_all), jnp.float32)
    a_all = a_all.at[:ns_n, :ns_n].set(as_)
    a_all = a_all.at[ns_pad:ns_pad + nq_n, ns_pad:ns_pad + nq_n].set(aq)

    pool_all = jnp.zeros((nsp + nqp, n_all), jnp.float32)
    pool_all = pool_all.at[:n_s_graphs, :ns_n].set(ps)
    pool_all = pool_all.at[nsp:nsp + n_q_graphs, ns_pad:ns_pad + nq_n].set(pq)

    # bf16 for MXU operands that are exact ({0,1}+I adjacency) or tolerant (features);
    # mean-pool matrix stays f32 so pooling is exact.
    return x_all.astype(jnp.bfloat16), a_all.astype(jnp.bfloat16), pool_all


# ----------------------------------------------------------------------------
# Main
# ----------------------------------------------------------------------------

if __name__ == "__main__":
    NODE_DIM = 16
    EMB_DIM = 32
    MOL_LAYERS = 2
    REL_LAYERS = 2
    EDGE_HIDDEN = 32
    TASK_NUM = 8
    N_SUPPORT = 4
    N_QUERY = 3
    NODES_PER_GRAPH = 6

    root = jax.random.PRNGKey(0)
    k_par, k_s, k_q, k_sy, k_qy = jax.random.split(root, 5)

    params = init_params(k_par, NODE_DIM, EMB_DIM, MOL_LAYERS, REL_LAYERS,
                         EDGE_HIDDEN, TASK_NUM)

    nsp = _r8(N_SUPPORT)
    nqp = _r8(N_QUERY)
    x_all, a_all, pool_all = make_combined_graph_batch(
        k_s, k_q, N_SUPPORT, N_QUERY, NODES_PER_GRAPH, NODE_DIM, nsp, nqp)

    s_y = jax.random.randint(k_sy, (N_SUPPORT,), 0, 2, jnp.int32)
    q_y = jax.random.randint(k_qy, (N_QUERY,), 0, 2, jnp.int32)
    sampled_task = jnp.int32(3)

    fwd = jax.jit(functools.partial(gs_meta_forward,
                                    n_s=N_SUPPORT, n_q=N_QUERY,
                                    nsp=nsp, nqp=nqp, emb=EMB_DIM))
    s_logit, q_logit, s_label, q_label, graph_f = fwd(
        params, x_all, a_all, pool_all, s_y, q_y, sampled_task)

    jax.block_until_ready((s_logit, q_logit, s_label, q_label, graph_f))

    assert s_logit.shape == (N_QUERY * N_SUPPORT, 2)
    assert q_logit.shape == (N_QUERY, 2)
    assert s_label.shape == (N_QUERY * N_SUPPORT,)
    assert q_label.shape == (N_QUERY,)
    assert graph_f.shape == (N_QUERY, N_SUPPORT + 1, EMB_DIM)
    assert bool(jnp.all(jnp.isfinite(s_logit)))
    assert bool(jnp.all(jnp.isfinite(q_logit)))
    assert bool(jnp.all(jnp.isfinite(graph_f)))

    print("KERNEL_OK")
</pallas_src>

<mosaic_0001>
module attributes {stable_mosaic.version = 11 : i64} {
  func.func @kernel(%arg0: memref<48x128xbf16, #tpu.memory_space<vmem>>, %arg1: memref<48x48xbf16, #tpu.memory_space<vmem>>, %arg2: memref<16x48xf32, #tpu.memory_space<vmem>>, %arg3: memref<128x128xbf16, #tpu.memory_space<vmem>>, %arg4: memref<1x128xf32, #tpu.memory_space<vmem>>, %arg5: memref<128x128xbf16, #tpu.memory_space<vmem>>, %arg6: memref<1x128xf32, #tpu.memory_space<vmem>>, %arg7: memref<128x128xbf16, #tpu.memory_space<vmem>>, %arg8: memref<1x128xf32, #tpu.memory_space<vmem>>, %arg9: memref<128x128xbf16, #tpu.memory_space<vmem>>, %arg10: memref<1x128xf32, #tpu.memory_space<vmem>>, %arg11: memref<1x128xbf16, #tpu.memory_space<vmem>>, %arg12: memref<8x128xf32, #tpu.memory_space<vmem>>, %arg13: memref<128x128xbf16, #tpu.memory_space<vmem>>, %arg14: memref<128x128xbf16, #tpu.memory_space<vmem>>, %arg15: memref<1x128xf32, #tpu.memory_space<vmem>>, %arg16: memref<128x128xbf16, #tpu.memory_space<vmem>>, %arg17: memref<1x128xf32, #tpu.memory_space<vmem>>, %arg18: memref<128x128xbf16, #tpu.memory_space<vmem>>, %arg19: memref<1x128xf32, #tpu.memory_space<vmem>>, %arg20: memref<128x128xbf16, #tpu.memory_space<vmem>>, %arg21: memref<1x128xf32, #tpu.memory_space<vmem>>, %arg22: memref<128x128xbf16, #tpu.memory_space<vmem>>, %arg23: memref<1x128xf32, #tpu.memory_space<vmem>>, %arg24: memref<128x128xbf16, #tpu.memory_space<vmem>>, %arg25: memref<1x128xf32, #tpu.memory_space<vmem>>, %arg26: memref<128x128xbf16, #tpu.memory_space<vmem>>, %arg27: memref<1x128xf32, #tpu.memory_space<vmem>>, %arg28: memref<8x128xf32, #tpu.memory_space<vmem>>, %arg29: memref<8x128xf32, #tpu.memory_space<vmem>>, %arg30: memref<8x128xf32, #tpu.memory_space<vmem>>, %arg31: memref<8x128xf32, #tpu.memory_space<vmem>>) attributes {dimension_semantics = [], scalar_prefetch = 0 : i64, scratch_operands = 0 : i64, tpu.core_type = #tpu.core_type<tc>} {
    %c0 = arith.constant 0 : index
    %c0_0 = arith.constant 0 : index
    %0 = vector.load %arg1[%c0, %c0_0] : memref<48x48xbf16, #tpu.memory_space<vmem>>, vector<48x48xbf16>
    %c0_1 = arith.constant 0 : index
    %c0_2 = arith.constant 0 : index
    %1 = vector.load %arg0[%c0_1, %c0_2] : memref<48x128xbf16, #tpu.memory_space<vmem>>, vector<48x128xbf16>
    %2 = arith.extf %1 : vector<48x128xbf16> to vector<48x128xf32>
    %3 = arith.truncf %2 : vector<48x128xf32> to vector<48x128xbf16>
    %cst = arith.constant dense<0.000000e+00> : vector<48x128xf32>
    %4 = tpu.matmul %0, %3, %cst {dimension_numbers = #tpu.dot_dimension_numbers<[1], [0], [0], [1], [0, 0, 1, 1], [], []>} : vector<48x48xbf16>, vector<48x128xbf16>, vector<48x128xf32> -> vector<48x128xf32>
    %c0_3 = arith.constant 0 : index
    %c0_4 = arith.constant 0 : index
    %5 = vector.load %arg3[%c0_3, %c0_4] : memref<128x128xbf16, #tpu.memory_space<vmem>>, vector<128x128xbf16>
    %6 = arith.truncf %4 : vector<48x128xf32> to vector<48x128xbf16>
    %cst_5 = arith.constant dense<0.000000e+00> : vector<48x128xf32>
    %7 = tpu.matmul %6, %5, %cst_5 {dimension_numbers = #tpu.dot_dimension_numbers<[1], [0], [0], [1], [0, 0, 1, 1], [], []>} : vector<48x128xbf16>, vector<128x128xbf16>, vector<48x128xf32> -> vector<48x128xf32>
    %c0_6 = arith.constant 0 : index
    %c0_7 = arith.constant 0 : index
    %8 = vector.load %arg4[%c0_6, %c0_7] : memref<1x128xf32, #tpu.memory_space<vmem>>, vector<1x128xf32>
    %9 = vector.broadcast %8 : vector<1x128xf32> to vector<48x128xf32>
    %10 = arith.addf %7, %9 : vector<48x128xf32>
    %cst_8 = arith.constant 0.000000e+00 : f32
    %11 = vector.broadcast %cst_8 : f32 to vector<48x128xf32>
    %12 = arith.maximumf %10, %11 : vector<48x128xf32>
    %c0_9 = arith.constant 0 : index
    %c0_10 = arith.constant 0 : index
    %13 = vector.load %arg5[%c0_9, %c0_10] : memref<128x128xbf16, #tpu.memory_space<vmem>>, vector<128x128xbf16>
    %14 = arith.truncf %12 : vector<48x128xf32> to vector<48x128xbf16>
    %cst_11 = arith.constant dense<0.000000e+00> : vector<48x128xf32>
    %15 = tpu.matmul %14, %13, %cst_11 {dimension_numbers = #tpu.dot_dimension_numbers<[1], [0], [0], [1], [0, 0, 1, 1], [], []>} : vector<48x128xbf16>, vector<128x128xbf16>, vector<48x128xf32> -> vector<48x128xf32>
    %c0_12 = arith.constant 0 : index
    %c0_13 = arith.constant 0 : index
    %16 = vector.load %arg6[%c0_12, %c0_13] : memref<1x128xf32, #tpu.memory_space<vmem>>, vector<1x128xf32>
    %17 = vector.broadcast %16 : vector<1x128xf32> to vector<48x128xf32>
    %18 = arith.addf %15, %17 : vector<48x128xf32>
    %cst_14 = arith.constant 0.000000e+00 : f32
    %19 = vector.broadcast %cst_14 : f32 to vector<48x128xf32>
    %20 = arith.maximumf %18, %19 : vector<48x128xf32>
    %21 = arith.truncf %20 : vector<48x128xf32> to vector<48x128xbf16>
    %cst_15 = arith.constant dense<0.000000e+00> : vector<48x128xf32>
    %22 = tpu.matmul %0, %21, %cst_15 {dimension_numbers = #tpu.dot_dimension_numbers<[1], [0], [0], [1], [0, 0, 1, 1], [], []>} : vector<48x48xbf16>, vector<48x128xbf16>, vector<48x128xf32> -> vector<48x128xf32>
    %c0_16 = arith.constant 0 : index
    %c0_17 = arith.constant 0 : index
    %23 = vector.load %arg7[%c0_16, %c0_17] : memref<128x128xbf16, #tpu.memory_space<vmem>>, vector<128x128xbf16>
    %24 = arith.truncf %22 : vector<48x128xf32> to vector<48x128xbf16>
    %cst_18 = arith.constant dense<0.000000e+00> : vector<48x128xf32>
    %25 = tpu.matmul %24, %23, %cst_18 {dimension_numbers = #tpu.dot_dimension_numbers<[1], [0], [0], [1], [0, 0, 1, 1], [], []>} : vector<48x128xbf16>, vector<128x128xbf16>, vector<48x128xf32> -> vector<48x128xf32>
    %c0_19 = arith.constant 0 : index
    %c0_20 = arith.constant 0 : index
    %26 = vector.load %arg8[%c0_19, %c0_20] : memref<1x128xf32, #tpu.memory_space<vmem>>, vector<1x128xf32>
    %27 = vector.broadcast %26 : vector<1x128xf32> to vector<48x128xf32>
    %28 = arith.addf %25, %27 : vector<48x128xf32>
    %cst_21 = arith.constant 0.000000e+00 : f32
    %29 = vector.broadcast %cst_21 : f32 to vector<48x128xf32>
    %30 = arith.maximumf %28, %29 : vector<48x128xf32>
    %c0_22 = arith.constant 0 : index
    %c0_23 = arith.constant 0 : index
    %31 = vector.load %arg9[%c0_22, %c0_23] : memref<128x128xbf16, #tpu.memory_space<vmem>>, vector<128x128xbf16>
    %32 = arith.truncf %30 : vector<48x128xf32> to vector<48x128xbf16>
    %cst_24 = arith.constant dense<0.000000e+00> : vector<48x128xf32>
    %33 = tpu.matmul %32, %31, %cst_24 {dimension_numbers = #tpu.dot_dimension_numbers<[1], [0], [0], [1], [0, 0, 1, 1], [], []>} : vector<48x128xbf16>, vector<128x128xbf16>, vector<48x128xf32> -> vector<48x128xf32>
    %c0_25 = arith.constant 0 : index
    %c0_26 = arith.constant 0 : index
    %34 = vector.load %arg10[%c0_25, %c0_26] : memref<1x128xf32, #tpu.memory_space<vmem>>, vector<1x128xf32>
    %35 = vector.broadcast %34 : vector<1x128xf32> to vector<48x128xf32>
    %36 = arith.addf %33, %35 : vector<48x128xf32>
    %c0_27 = arith.constant 0 : index
    %c0_28 = arith.constant 0 : index
    %37 = vector.load %arg2[%c0_27, %c0_28] : memref<16x48xf32, #tpu.memory_space<vmem>>, vector<16x48xf32>
    %cst_29 = arith.constant dense<0.000000e+00> : vector<16x128xf32>
    %38 = tpu.matmul %37, %36, %cst_29 {dimension_numbers = #tpu.dot_dimension_numbers<[1], [0], [0], [1], [0, 0, 1, 1], [], []>} : vector<16x48xf32>, vector<48x128xf32>, vector<16x128xf32> -> vector<16x128xf32>
    %39 = vector.extract_strided_slice %38 {offsets = [0, 0], sizes = [8, 128], strides = [1, 1]} : vector<16x128xf32> to vector<8x128xf32>
    %40 = vector.extract_strided_slice %38 {offsets = [8, 0], sizes = [8, 128], strides = [1, 1]} : vector<16x128xf32> to vector<8x128xf32>
    %c0_30 = arith.constant 0 : index
    %c0_31 = arith.constant 0 : index
    %41 = vector.load %arg11[%c0_30, %c0_31] : memref<1x128xbf16, #tpu.memory_space<vmem>>, vector<1x128xbf16>
    %c0_32 = arith.constant 0 : index
    %c0_33 = arith.constant 0 : index
    %42 = vector.load %arg14[%c0_32, %c0_33] : memref<128x128xbf16, #tpu.memory_space<vmem>>, vector<128x128xbf16>
    %cst_34 = arith.constant dense<0.000000e+00> : vector<1x128xf32>
    %43 = tpu.matmul %41, %42, %cst_34 {dimension_numbers = #tpu.dot_dimension_numbers<[1], [0], [0], [1], [0, 0, 1, 1], [], []>} : vector<1x128xbf16>, vector<128x128xbf16>, vector<1x128xf32> -> vector<1x128xf32>
    %c0_35 = arith.constant 0 : index
    %c0_36 = arith.constant 0 : index
    %44 = vector.load %arg15[%c0_35, %c0_36] : memref<1x128xf32, #tpu.memory_space<vmem>>, vector<1x128xf32>
    %45 = arith.addf %43, %44 : vector<1x128xf32>
    %c0_37 = arith.constant 0 : index
    %c0_38 = arith.constant 0 : index
    %46 = vector.load %arg13[%c0_37, %c0_38] : memref<128x128xbf16, #tpu.memory_space<vmem>>, vector<128x128xbf16>
    %47 = arith.truncf %39 : vector<8x128xf32> to vector<8x128xbf16>
    %cst_39 = arith.constant dense<0.000000e+00> : vector<8x128xf32>
    %48 = tpu.matmul %47, %46, %cst_39 {dimension_numbers = #tpu.dot_dimension_numbers<[1], [0], [0], [1], [0, 0, 1, 1], [], []>} : vector<8x128xbf16>, vector<128x128xbf16>, vector<8x128xf32> -> vector<8x128xf32>
    %49 = vector.broadcast %45 : vector<1x128xf32> to vector<8x128xf32>
    %50 = arith.addf %48, %49 : vector<8x128xf32>
    %cst_40 = arith.constant 0.000000e+00 : f32
    %51 = vector.broadcast %cst_40 : f32 to vector<8x128xf32>
    %52 = arith.maximumf %50, %51 : vector<8x128xf32>
    %c0_41 = arith.constant 0 : index
    %c0_42 = arith.constant 0 : index
    %53 = vector.load %arg16[%c0_41, %c0_42] : memref<128x128xbf16, #tpu.memory_space<vmem>>, vector<128x128xbf16>
    %54 = arith.truncf %52 : vector<8x128xf32> to vector<8x128xbf16>
    %cst_43 = arith.constant dense<0.000000e+00> : vector<8x128xf32>
    %55 = tpu.matmul %54, %53, %cst_43 {dimension_numbers = #tpu.dot_dimension_numbers<[1], [0], [0], [1], [0, 0, 1, 1], [], []>} : vector<8x128xbf16>, vector<128x128xbf16>, vector<8x128xf32> -> vector<8x128xf32>
    %c0_44 = arith.constant 0 : index
    %c0_45 = arith.constant 0 : index
    %56 = vector.load %arg17[%c0_44, %c0_45] : memref<1x128xf32, #tpu.memory_space<vmem>>, vector<1x128xf32>
    %57 = vector.broadcast %56 : vector<1x128xf32> to vector<8x128xf32>
    %58 = arith.addf %55, %57 : vector<8x128xf32>
    %cst_46 = arith.constant 0.000000e+00 : f32
    %59 = vector.broadcast %cst_46 : f32 to vector<8x128xf32>
    %60 = arith.maximumf %58, %59 : vector<8x128xf32>
    %c0_47 = arith.constant 0 : index
    %c0_48 = arith.constant 0 : index
    %61 = vector.load %arg13[%c0_47, %c0_48] : memref<128x128xbf16, #tpu.memory_space<vmem>>, vector<128x128xbf16>
    %62 = arith.truncf %40 : vector<8x128xf32> to vector<8x128xbf16>
    %cst_49 = arith.constant dense<0.000000e+00> : vector<8x128xf32>
    %63 = tpu.matmul %62, %61, %cst_49 {dimension_numbers = #tpu.dot_dimension_numbers<[1], [0], [0], [1], [0, 0, 1, 1], [], []>} : vector<8x128xbf16>, vector<128x128xbf16>, vector<8x128xf32> -> vector<8x128xf32>
    %64 = vector.broadcast %45 : vector<1x128xf32> to vector<8x128xf32>
    %65 = arith.addf %63, %64 : vector<8x128xf32>
    %cst_50 = arith.constant 0.000000e+00 : f32
    %66 = vector.broadcast %cst_50 : f32 to vector<8x128xf32>
    %67 = arith.maximumf %65, %66 : vector<8x128xf32>
    %c0_51 = arith.constant 0 : index
    %c0_52 = arith.constant 0 : index
    %68 = vector.load %arg16[%c0_51, %c0_52] : memref<128x128xbf16, #tpu.memory_space<vmem>>, vector<128x128xbf16>
    %69 = arith.truncf %67 : vector<8x128xf32> to vector<8x128xbf16>
    %cst_53 = arith.constant dense<0.000000e+00> : vector<8x128xf32>
    %70 = tpu.matmul %69, %68, %cst_53 {dimension_numbers = #tpu.dot_dimension_numbers<[1], [0], [0], [1], [0, 0, 1, 1], [], []>} : vector<8x128xbf16>, vector<128x128xbf16>, vector<8x128xf32> -> vector<8x128xf32>
    %c0_54 = arith.constant 0 : index
    %c0_55 = arith.constant 0 : index
    %71 = vector.load %arg17[%c0_54, %c0_55] : memref<1x128xf32, #tpu.memory_space<vmem>>, vector<1x128xf32>
    %72 = vector.broadcast %71 : vector<1x128xf32> to vector<8x128xf32>
    %73 = arith.addf %70, %72 : vector<8x128xf32>
    %cst_56 = arith.constant 0.000000e+00 : f32
    %74 = vector.broadcast %cst_56 : f32 to vector<8x128xf32>
    %75 = arith.maximumf %73, %74 : vector<8x128xf32>
    %c0_57 = arith.constant 0 : index
    %c0_58 = arith.constant 0 : index
    %76 = vector.load %arg18[%c0_57, %c0_58] : memref<128x128xbf16, #tpu.memory_space<vmem>>, vector<128x128xbf16>
    %77 = arith.truncf %60 : vector<8x128xf32> to vector<8x128xbf16>
    %cst_59 = arith.constant dense<0.000000e+00> : vector<8x128xf32>
    %78 = tpu.matmul %77, %76, %cst_59 {dimension_numbers = #tpu.dot_dimension_numbers<[1], [0], [0], [1], [0, 0, 1, 1], [], []>} : vector<8x128xbf16>, vector<128x128xbf16>, vector<8x128xf32> -> vector<8x128xf32>
    %c0_60 = arith.constant 0 : index
    %c0_61 = arith.constant 0 : index
    %79 = vector.load %arg19[%c0_60, %c0_61] : memref<1x128xf32, #tpu.memory_space<vmem>>, vector<1x128xf32>
    %80 = vector.broadcast %79 : vector<1x128xf32> to vector<8x128xf32>
    %81 = arith.addf %78, %80 : vector<8x128xf32>
    %cst_62 = arith.constant 0.000000e+00 : f32
    %82 = vector.broadcast %cst_62 : f32 to vector<8x128xf32>
    %83 = arith.maximumf %81, %82 : vector<8x128xf32>
    %c0_63 = arith.constant 0 : index
    %c0_64 = arith.constant 0 : index
    %84 = vector.load %arg20[%c0_63, %c0_64] : memref<128x128xbf16, #tpu.memory_space<vmem>>, vector<128x128xbf16>
    %85 = arith.truncf %83 : vector<8x128xf32> to vector<8x128xbf16>
    %cst_65 = arith.constant dense<0.000000e+00> : vector<8x128xf32>
    %86 = tpu.matmul %85, %84, %cst_65 {dimension_numbers = #tpu.dot_dimension_numbers<[1], [0], [0], [1], [0, 0, 1, 1], [], []>} : vector<8x128xbf16>, vector<128x128xbf16>, vector<8x128xf32> -> vector<8x128xf32>
    %c0_66 = arith.constant 0 : index
    %c0_67 = arith.constant 0 : index
    %87 = vector.load %arg21[%c0_66, %c0_67] : memref<1x128xf32, #tpu.memory_space<vmem>>, vector<1x128xf32>
    %88 = vector.broadcast %87 : vector<1x128xf32> to vector<8x128xf32>
    %89 = arith.addf %86, %88 : vector<8x128xf32>
    %cst_68 = arith.constant 0.000000e+00 : f32
    %90 = vector.broadcast %cst_68 : f32 to vector<8x128xf32>
    %91 = arith.maximumf %89, %90 : vector<8x128xf32>
    %c0_69 = arith.constant 0 : index
    %c0_70 = arith.constant 0 : index
    %92 = vector.load %arg18[%c0_69, %c0_70] : memref<128x128xbf16, #tpu.memory_space<vmem>>, vector<128x128xbf16>
    %93 = arith.truncf %75 : vector<8x128xf32> to vector<8x128xbf16>
    %cst_71 = arith.constant dense<0.000000e+00> : vector<8x128xf32>
    %94 = tpu.matmul %93, %92, %cst_71 {dimension_numbers = #tpu.dot_dimension_numbers<[1], [0], [0], [1], [0, 0, 1, 1], [], []>} : vector<8x128xbf16>, vector<128x128xbf16>, vector<8x128xf32> -> vector<8x128xf32>
    %c0_72 = arith.constant 0 : index
    %c0_73 = arith.constant 0 : index
    %95 = vector.load %arg19[%c0_72, %c0_73] : memref<1x128xf32, #tpu.memory_space<vmem>>, vector<1x128xf32>
    %96 = vector.broadcast %95 : vector<1x128xf32> to vector<8x128xf32>
    %97 = arith.addf %94, %96 : vector<8x128xf32>
    %cst_74 = arith.constant 0.000000e+00 : f32
    %98 = vector.broadcast %cst_74 : f32 to vector<8x128xf32>
    %99 = arith.maximumf %97, %98 : vector<8x128xf32>
    %c0_75 = arith.constant 0 : index
    %c0_76 = arith.constant 0 : index
    %100 = vector.load %arg20[%c0_75, %c0_76] : memref<128x128xbf16, #tpu.memory_space<vmem>>, vector<128x128xbf16>
    %101 = arith.truncf %99 : vector<8x128xf32> to vector<8x128xbf16>
    %cst_77 = arith.constant dense<0.000000e+00> : vector<8x128xf32>
    %102 = tpu.matmul %101, %100, %cst_77 {dimension_numbers = #tpu.dot_dimension_numbers<[1], [0], [0], [1], [0, 0, 1, 1], [], []>} : vector<8x128xbf16>, vector<128x128xbf16>, vector<8x128xf32> -> vector<8x128xf32>
    %c0_78 = arith.constant 0 : index
    %c0_79 = arith.constant 0 : index
    %103 = vector.load %arg21[%c0_78, %c0_79] : memref<1x128xf32, #tpu.memory_space<vmem>>, vector<1x128xf32>
    %104 = vector.broadcast %103 : vector<1x128xf32> to vector<8x128xf32>
    %105 = arith.addf %102, %104 : vector<8x128xf32>
    %cst_80 = arith.constant 0.000000e+00 : f32
    %106 = vector.broadcast %cst_80 : f32 to vector<8x128xf32>
    %107 = arith.maximumf %105, %106 : vector<8x128xf32>
    %108 = vector.shape_cast %91 : vector<8x128xf32> to vector<1x8x128xf32>
    %109 = vector.shape_cast %107 : vector<8x128xf32> to vector<8x1x128xf32>
    %110 = vector.broadcast %108 : vector<1x8x128xf32> to vector<8x8x128xf32>
    %111 = vector.broadcast %109 : vector<8x1x128xf32> to vector<8x8x128xf32>
    %112 = arith.subf %110, %111 : vector<8x8x128xf32>
    %113 = math.absf %112 : vector<8x8x128xf32>
    %114 = vector.shape_cast %113 : vector<8x8x128xf32> to vector<64x128xf32>
    %c0_81 = arith.constant 0 : index
    %c0_82 = arith.constant 0 : index
    %115 = vector.load %arg22[%c0_81, %c0_82] : memref<128x128xbf16, #tpu.memory_space<vmem>>, vector<128x128xbf16>
    %116 = arith.truncf %114 : vector<64x128xf32> to vector<64x128xbf16>
    %cst_83 = arith.constant dense<0.000000e+00> : vector<64x128xf32>
    %117 = tpu.matmul %116, %115, %cst_83 {dimension_numbers = #tpu.dot_dimension_numbers<[1], [0], [0], [1], [0, 0, 1, 1], [], []>} : vector<64x128xbf16>, vector<128x128xbf16>, vector<64x128xf32> -> vector<64x128xf32>
    %c0_84 = arith.constant 0 : index
    %c0_85 = arith.constant 0 : index
    %118 = vector.load %arg23[%c0_84, %c0_85] : memref<1x128xf32, #tpu.memory_space<vmem>>, vector<1x128xf32>
    %119 = vector.broadcast %118 : vector<1x128xf32> to vector<64x128xf32>
    %120 = arith.addf %117, %119 : vector<64x128xf32>
    %cst_86 = arith.constant 0.000000e+00 : f32
    %121 = vector.broadcast %cst_86 : f32 to vector<64x128xf32>
    %122 = arith.maximumf %120, %121 : vector<64x128xf32>
    %c0_87 = arith.constant 0 : index
    %c0_88 = arith.constant 0 : index
    %123 = vector.load %arg24[%c0_87, %c0_88] : memref<128x128xbf16, #tpu.memory_space<vmem>>, vector<128x128xbf16>
    %124 = arith.truncf %122 : vector<64x128xf32> to vector<64x128xbf16>
    %cst_89 = arith.constant dense<0.000000e+00> : vector<64x128xf32>
    %125 = tpu.matmul %124, %123, %cst_89 {dimension_numbers = #tpu.dot_dimension_numbers<[1], [0], [0], [1], [0, 0, 1, 1], [], []>} : vector<64x128xbf16>, vector<128x128xbf16>, vector<64x128xf32> -> vector<64x128xf32>
    %c0_90 = arith.constant 0 : index
    %c0_91 = arith.constant 0 : index
    %126 = vector.load %arg25[%c0_90, %c0_91] : memref<1x128xf32, #tpu.memory_space<vmem>>, vector<1x128xf32>
    %127 = vector.broadcast %126 : vector<1x128xf32> to vector<64x128xf32>
    %128 = arith.addf %125, %127 : vector<64x128xf32>
    %129 = vector.shape_cast %128 : vector<64x128xf32> to vector<8x8x128xf32>
    %cst_92 = arith.constant dense<0.000000e+00> : vector<8x8xf32>
    %130 = vector.multi_reduction <add>, %129, %cst_92 [2] : vector<8x8x128xf32> to vector<8x8xf32>
    %131 = tpu.iota {dimensions = array<i32: 1>} : vector<8x8xi32>
    %c4_i32 = arith.constant 4 : i32
    %132 = vector.broadcast %c4_i32 : i32 to vector<8x8xi32>
    %133 = arith.cmpi slt, %131, %132 : vector<8x8xi32>
    %cst_93 = arith.constant -1.000000e+30 : f32
    %134 = vector.broadcast %cst_93 : f32 to vector<8x8xf32>
    %135 = arith.select %133, %130, %134 : vector<8x8xi1>, vector<8x8xf32>
    %cst_94 = arith.constant dense<0xFF800000> : vector<8xf32>
    %136 = vector.multi_reduction <maximumf>, %135, %cst_94 [1] : vector<8x8xf32> to vector<8xf32>
    %137 = vector.shape_cast %136 : vector<8xf32> to vector<8x1xf32>
    %138 = vector.broadcast %137 : vector<8x1xf32> to vector<8x8xf32>
    %139 = arith.subf %135, %138 : vector<8x8xf32>
    %140 = math.exp %139 : vector<8x8xf32>
    %cst_95 = arith.constant dense<0.000000e+00> : vector<8xf32>
    %141 = vector.multi_reduction <add>, %140, %cst_95 [1] : vector<8x8xf32> to vector<8xf32>
    %142 = vector.shape_cast %141 : vector<8xf32> to vector<8x1xf32>
    %143 = tpu.reciprocal %142 {approx = true} : vector<8x1xf32> -> vector<8x1xf32>
    %144 = vector.broadcast %143 : vector<8x1xf32> to vector<8x8xf32>
    %145 = arith.mulf %140, %144 : vector<8x8xf32>
    %c0_96 = arith.constant 0 : index
    %c0_97 = arith.constant 0 : index
    %146 = vector.load %arg12[%c0_96, %c0_97] : memref<8x128xf32, #tpu.memory_space<vmem>>, vector<8x128xf32>
    %cst_98 = arith.constant dense<0.000000e+00> : vector<8x128xf32>
    %147 = tpu.matmul %145, %146, %cst_98 {dimension_numbers = #tpu.dot_dimension_numbers<[1], [0], [0], [1], [0, 0, 1, 1], [], []>} : vector<8x8xf32>, vector<8x128xf32>, vector<8x128xf32> -> vector<8x128xf32>
    %c0_99 = arith.constant 0 : index
    %c0_100 = arith.constant 0 : index
    %148 = vector.load %arg26[%c0_99, %c0_100] : memref<128x128xbf16, #tpu.memory_space<vmem>>, vector<128x128xbf16>
    %149 = arith.truncf %107 : vector<8x128xf32> to vector<8x128xbf16>
    %cst_101 = arith.constant dense<0.000000e+00> : vector<8x128xf32>
    %150 = tpu.matmul %149, %148, %cst_101 {dimension_numbers = #tpu.dot_dimension_numbers<[1], [0], [0], [1], [0, 0, 1, 1], [], []>} : vector<8x128xbf16>, vector<128x128xbf16>, vector<8x128xf32> -> vector<8x128xf32>
    %c0_102 = arith.constant 0 : index
    %c0_103 = arith.constant 0 : index
    %151 = vector.load %arg27[%c0_102, %c0_103] : memref<1x128xf32, #tpu.memory_space<vmem>>, vector<1x128xf32>
    %152 = vector.broadcast %151 : vector<1x128xf32> to vector<8x128xf32>
    %153 = arith.addf %150, %152 : vector<8x128xf32>
    %154 = arith.addf %153, %147 : vector<8x128xf32>
    %c0_104 = arith.constant 0 : index
    %c0_105 = arith.constant 0 : index
    %155 = vector.load %arg29[%c0_104, %c0_105] : memref<8x128xf32, #tpu.memory_space<vmem>>, vector<8x128xf32>
    tpu.vector_store %arg29[%c0_104, %c0_105], %154 {strides = array<i32>} : memref<8x128xf32, #tpu.memory_space<vmem>>, vector<8x128xf32>,
    %c0_106 = arith.constant 0 : index
    %c0_107 = arith.constant 0 : index
    %156 = vector.load %arg26[%c0_106, %c0_107] : memref<128x128xbf16, #tpu.memory_space<vmem>>, vector<128x128xbf16>
    %157 = arith.truncf %91 : vector<8x128xf32> to vector<8x128xbf16>
    %cst_108 = arith.constant dense<0.000000e+00> : vector<8x128xf32>
    %158 = tpu.matmul %157, %156, %cst_108 {dimension_numbers = #tpu.dot_dimension_numbers<[1], [0], [0], [1], [0, 0, 1, 1], [], []>} : vector<8x128xbf16>, vector<128x128xbf16>, vector<8x128xf32> -> vector<8x128xf32>
    %c0_109 = arith.constant 0 : index
    %c0_110 = arith.constant 0 : index
    %159 = vector.load %arg27[%c0_109, %c0_110] : memref<1x128xf32, #tpu.memory_space<vmem>>, vector<1x128xf32>
    %160 = vector.broadcast %159 : vector<1x128xf32> to vector<8x128xf32>
    %161 = arith.addf %158, %160 : vector<8x128xf32>
    %c0_111 = arith.constant 0 : index
    %c0_112 = arith.constant 0 : index
    %162 = vector.load %arg28[%c0_111, %c0_112] : memref<8x128xf32, #tpu.memory_space<vmem>>, vector<8x128xf32>
    tpu.vector_store %arg28[%c0_111, %c0_112], %161 {strides = array<i32>} : memref<8x128xf32, #tpu.memory_space<vmem>>, vector<8x128xf32>,
    %c0_113 = arith.constant 0 : index
    %c0_114 = arith.constant 0 : index
    %163 = vector.load %arg30[%c0_113, %c0_114] : memref<8x128xf32, #tpu.memory_space<vmem>>, vector<8x128xf32>
    tpu.vector_store %arg30[%c0_113, %c0_114], %91 {strides = array<i32>} : memref<8x128xf32, #tpu.memory_space<vmem>>, vector<8x128xf32>,
    %c0_115 = arith.constant 0 : index
    %c0_116 = arith.constant 0 : index
    %164 = vector.load %arg31[%c0_115, %c0_116] : memref<8x128xf32, #tpu.memory_space<vmem>>, vector<8x128xf32>
    tpu.vector_store %arg31[%c0_115, %c0_116], %107 {strides = array<i32>} : memref<8x128xf32, #tpu.memory_space<vmem>>, vector<8x128xf32>,
    return
  }
}

</mosaic_0001>

<bundles_post_ra>
// kernel: gs_meta_forward.1
= control target key start
LH: loop header
LB: loop body
LE: loop exit
PB: predicated region body
PF: predicated region fallthrough
CT: control target
= control target key end

     0   :  { %s4212_s6 = smov 1   ;;  %s4213_s10 = smov 2   ;;  %s4942_s0 = inlined_call_operand.smem [shape: u32[32], index: -1, kind: input, shape index: {}] }
   0x1   :  { %s4278_s5 = sld [smem:[%s4942_s0]]   ;;  %s4214_s14 = smov 3  }
   0x2   :  { %s4283_s9 = sld [smem:[%s4942_s0 + %s4212_s6]]   ;;  %s4215_s18 = smov 4  }
   0x3   :  { %s4288_s13 = sld [smem:[%s4942_s0 + %s4213_s10]]   ;;  %s4216_s22 = smov 5  }
   0x4   :  { %s4293_s17 = sld [smem:[%s4942_s0 + %s4214_s14]]   ;;  %s4217_s26 = smov 6  }
   0x5   :  { %s4298_s21 = sld [smem:[%s4942_s0 + %s4215_s18]]   ;;  %s4218_s30 = smov 7  }
   0x6   :  { %s4303_s25 = sld [smem:[%s4942_s0 + %s4216_s22]]   ;;  %s4219_s4 = smov 8  }
   0x7   :  { %4955 = sst [smem:[#allocation48_spill]] %s4278_s5  ;;  %s4220_s10 = smov 9  }
   0x8   :  { %4956 = sst [smem:[#allocation49_spill]] %s4283_s9  ;;  %s4221_s15 = smov 10  }
   0x9   :  { %4957 = sst [smem:[#allocation50_spill]] %s4288_s13  ;;  %s4222_s20 = smov 11  }
   0xa   :  { %s4308_s29 = sld [smem:[%s4942_s0 + %s4217_s26]]   ;;  %s4223_s26 = smov 12  }
   0xb   :  { %s4313_s3 = sld [smem:[%s4942_s0 + %s4218_s30]]   ;;  %s4224_s1 = smov 13  }
   0xc   :  { %s4318_s8 = sld [smem:[%s4942_s0 + %s4219_s4]]   ;;  %s4225_s7 = smov 14  }
   0xd   :  { %s4323_s14 = sld [smem:[%s4942_s0 + %s4220_s10]]   ;;  %s4227_s22 = smov 16  }
   0xe   :  { %s4328_s19 = sld [smem:[%s4942_s0 + %s4221_s15]]   ;;  %s4226_s15 = smov 15  }
   0xf   :  { %s4333_s24 = sld [smem:[%s4942_s0 + %s4222_s20]]   ;;  %s4228_s28 = smov 17  }
  0x10   :  { %s4338_s30 = sld [smem:[%s4942_s0 + %s4223_s26]]  }
  0x11   :  { %4958 = sst [smem:[#allocation51_spill]] %s4313_s3 }
  0x12   :  { %s4343_s6 = sld [smem:[%s4942_s0 + %s4224_s1]]  }
  0x13   :  { %s4348_s12 = sld [smem:[%s4942_s0 + %s4225_s7]]   ;;  %s4229_s7 = smov 18  }
  0x14   :  { %s4353_s20 = sld [smem:[%s4942_s0 + %s4226_s15]]   ;;  %s4230_s15 = smov 19  }
  0x15   :  { %4959 = sst [smem:[#allocation52_spill]] %s4333_s24 }
  0x16   :  { %4960 = sst [smem:[#allocation53_spill]] %s4338_s30 }
  0x17   :  { %s4358_s27 = sld [smem:[%s4942_s0 + %s4227_s22]]   ;;  %s4231_s22 = smov 20  }
  0x18   :  { %s4363_s4 = sld [smem:[%s4942_s0 + %s4228_s28]]   ;;  %s4232_s28 = smov 21  }
  0x19   :  { %4961 = sst [smem:[#allocation54_spill]] %s4348_s12 }
  0x1a   :  { %s4368_s30 = sld [smem:[%s4942_s0 + %s4229_s7]]   ;;  %s4233_s7 = smov 22  }
  0x1b   :  { %s4373_s24 = sld [smem:[%s4942_s0 + %s4230_s15]]   ;;  %s4234_s15 = smov 23  }
  0x1c   :  { %s4378_s13 = sld [smem:[%s4942_s0 + %s4231_s22]]   ;;  %s4235_s22 = smov 24  }
  0x1d   :  { %4962 = sst [smem:[#allocation55_spill]] %s4358_s27 }
  0x1e   :  { %s4383_s3 = sld [smem:[%s4942_s0 + %s4232_s28]]   ;;  %s4236_s28 = smov 25  }
  0x1f   :  { %s4388_s9 = sld [smem:[%s4942_s0 + %s4233_s7]]   ;;  %s4237_s7 = smov 26  }
  0x20   :  { %4963 = sst [smem:[#allocation56_spill]] %s4368_s30 }
  0x21   :  { %s4393_s5 = sld [smem:[%s4942_s0 + %s4234_s15]]   ;;  %s4238_s15 = smov 27  }
  0x22   :  { %4964 = sst [smem:[#allocation57_spill]] %s4378_s13 }
  0x23   :  { %s4398_s13 = sld [smem:[%s4942_s0 + %s4235_s22]]   ;;  %s4239_s22 = smov 28  }
  0x24   :  { %s4403_s30 = sld [smem:[%s4942_s0 + %s4236_s28]]   ;;  %s4240_s28 = smov 29  }
  0x25   :  { %4965 = sst [smem:[#allocation58_spill]] %s4388_s9 }
  0x26   :  { %s4408_s9 = sld [smem:[%s4942_s0 + %s4237_s7]]   ;;  %s4241_s7 = smov 30  }
  0x27   :  { %s4413_s27 = sld [smem:[%s4942_s0 + %s4238_s15]]   ;;  %s4242_s15 = smov 31  }
  0x28   :  { %s4423_s12 = sld [smem:[%s4942_s0 + %s4240_s28]]  }
  0x29   :  { %4966 = sst [smem:[#allocation59_spill]] %s4398_s13 }
  0x2a   :  { %s4418_s13 = sld [smem:[%s4942_s0 + %s4239_s22]]  }
  0x2c   :  { %4967 = sst [smem:[#allocation60_spill]] %s4408_s9 }
  0x2d   :  { %4968 = sst [smem:[#allocation61_spill]] %s4413_s27 }
  0x2e   :  { %s4428_s9 = sld [smem:[%s4942_s0 + %s4241_s7]]  }
  0x2f   :  { %s4433_s27 = sld [smem:[%s4942_s0 + %s4242_s15]]  }
  0x30   :  { %69 = vsyncpa [#allocation3], 0 }
  0x31   :  { %70 = vsyncpa [#allocation5], 0 }
  0x32   :  { %71 = vsyncpa [#allocation8], 0 }
  0x33   :  { %72 = vsyncpa [#allocation11], 0 }
  0x34   :  { %73 = vsyncpa [#allocation14], 0 }
  0x35   :  { %74 = vsyncpa [#allocation17], 0 }
  0x36   :  { %75 = vsyncpa [#allocation20], 0 }
  0x37   :  { %76 = vsyncpa [#allocation23], 0 }
  0x38   :  { %77 = vsyncpa [#allocation26], 0 }
  0x39   :  { %78 = vsyncpa [#allocation29], 0 }
  0x3a   :  { %79 = vsyncpa [#allocation32], 0 }
  0x3b   :  { %80 = vsyncpa [#allocation35], 0  ;;  %s4243_s22 = smov [#allocation4]   ;;  %s4244_s26 = smov [#allocation7]  }
  0x3c   :  { %s105_s23 = sshll.u32 %s4243_s22, 4  ;;  %s127_s0 = sshll.u32 %s4244_s26, 4  ;;  %s106_s23 = int_to_ptr.vmem [resolvable:$true] %s105_s23  ;;  %s128_s0 = int_to_ptr.vmem [resolvable:$true] %s127_s0 }
  0x3d   :  { %s3704_s28 = scalar_lea.hbm %s4298_s21, 16 }
  0x3e   :  { %p3705_p0 = scmp.ne.s32.totalorder %s4298_s21, %s3704_s28  ;;  %p3708_p1 = scmp.lt.u32.totalorder %s3704_s28, %s4298_s21 }
  0x40   :  { %p3710_p2 = pnand %p3708_p1, %p3705_p0 }
  0x42   :  { %3713 = shalt.err (!%p3710_p2)
}
  0x43   :  { %s3714_s1 = scalar_lea.vmem %s106_s23, 16  ;;  %s3718_s2 = scalar_lea.vmem %s106_s23, 32 }
  0x44   :  { %p3715_p3 = scmp.ne.s32.totalorder %s106_s23, %s3714_s1  ;;  %p3719_p4 = scmp.lt.s32.totalorder %s106_s23, %s106_s23 }
  0x45   :  { %p3720_p5 = scmp.lt.s32.totalorder %s3718_s2, %s3714_s1 }
  0x47   :  { %p3721_p6 = por %p3720_p5, %p3719_p4 }
  0x49   :  { %p3722_p7 = pnand %p3721_p6, %p3715_p3 }
  0x4b   :  { %3725 = shalt.err (!%p3722_p7)
}
  0x4c   :  { %108 = dma.hbm_to_vmem [thread:$0]  %s4298_s21, 16, %s106_s23, [#allocation5]  }
  0x4d   :  { %s3726_s7 = scalar_lea.hbm %s4308_s29, 16 }
  0x4e   :  { %p3727_p8 = scmp.ne.s32.totalorder %s4308_s29, %s3726_s7  ;;  %p3730_p9 = scmp.lt.u32.totalorder %s3726_s7, %s4308_s29 }
  0x50   :  { %p3732_p10 = pnand %p3730_p9, %p3727_p8 }
  0x52   :  { %3735 = shalt.err (!%p3732_p10)
}
  0x53   :  { %s3736_s10 = scalar_lea.vmem %s128_s0, 16  ;;  %s3740_s11 = scalar_lea.vmem %s128_s0, 32 }
  0x54   :  { %p3737_p11 = scmp.ne.s32.totalorder %s128_s0, %s3736_s10  ;;  %p3741_p12 = scmp.lt.s32.totalorder %s128_s0, %s128_s0 }
  0x55   :  { %p3742_p13 = scmp.lt.s32.totalorder %s3740_s11, %s3736_s10 }
  0x57   :  { %p3743_p0 = por %p3742_p13, %p3741_p12 }
  0x59   :  { %p3744_p1 = pnand %p3743_p0, %p3737_p11 }
  0x5b   :  { %3747 = shalt.err (!%p3744_p1)
}
  0x5c   :  { %130 = dma.hbm_to_vmem [thread:$0]  %s4308_s29, 16, %s128_s0, [#allocation8]  }
  0x5d   :  { %s4245_s15 = smov [#allocation10]   ;;  %s4246_s16 = smov [#allocation13]  }
  0x5e   :  { %s148_s21 = sshll.u32 %s4245_s15, 4  ;;  %s174_s18 = sshll.u32 %s4246_s16, 4  ;;  %s149_s21 = int_to_ptr.vmem [resolvable:$true] %s148_s21  ;;  %s4443_s18 = int_to_ptr.vmem [resolvable:$true] %s174_s18 }
  0x5f   :  { %s3748_s22 = scalar_lea.hbm %s4323_s14, 1024 }
  0x60   :  { %p3749_p2 = scmp.ne.s32.totalorder %s4323_s14, %s3748_s22  ;;  %p3752_p3 = scmp.lt.u32.totalorder %s3748_s22, %s4323_s14 }
  0x62   :  { %p3754_p4 = pnand %p3752_p3, %p3749_p2 }
  0x64   :  { %3757 = shalt.err (!%p3754_p4)
}
  0x65   :  { %s3758_s23 = scalar_lea.vmem %s149_s21, 1024  ;;  %p3763_p6 = scmp.lt.s32.totalorder %s149_s21, %s149_s21 }
  0x66   :  { %p3759_p5 = scmp.ne.s32.totalorder %s149_s21, %s3758_s23  ;;  %p3764_p7 = scmp.lt.s32.totalorder %s3758_s23, %s3758_s23 }
  0x68   :  { %p3765_p8 = por %p3764_p7, %p3763_p6 }
  0x6a   :  { %p3766_p9 = pnand %p3765_p8, %p3759_p5 }
  0x6c   :  { %3769 = shalt.err (!%p3766_p9)
}
  0x6d   :  { %s4247_s29 = smov 64   ;;  %s4248_s26 = smov 4  }
  0x6e   :  { %154 = dma.hbm_to_vmem [thread:$0]  %s4323_s14, 1024, %s149_s21, [#allocation11], %s4247_s29, %s4247_s29, %s4248_s26  }
  0x6f   :  { %s3770_s0 = scalar_lea.hbm %s4343_s6, 1024 }
  0x70   :  { %p3771_p10 = scmp.ne.s32.totalorder %s4343_s6, %s3770_s0  ;;  %p3774_p11 = scmp.lt.u32.totalorder %s3770_s0, %s4343_s6 }
  0x72   :  { %p3776_p12 = pnand %p3774_p11, %p3771_p10 }
  0x74   :  { %3779 = shalt.err (!%p3776_p12)
}
  0x75   :  { %s3780_s28 = scalar_lea.vmem %s4443_s18, 1024  ;;  %p3785_p0 = scmp.lt.s32.totalorder %s4443_s18, %s4443_s18 }
  0x76   :  { %p3781_p13 = scmp.ne.s32.totalorder %s4443_s18, %s3780_s28  ;;  %p3786_p1 = scmp.lt.s32.totalorder %s3780_s28, %s3780_s28 }
  0x78   :  { %p3787_p2 = por %p3786_p1, %p3785_p0 }
  0x7a   :  { %p3788_p3 = pnand %p3787_p2, %p3781_p13 }
  0x7c   :  { %3791 = shalt.err (!%p3788_p3)
}
  0x7d   :  { %180 = dma.hbm_to_vmem [thread:$0]  %s4343_s6, 1024, %s4443_s18, [#allocation14], %s4247_s29, %s4247_s29, %s4248_s26  }
  0x7e   :  { %s4249_s14 = smov [#allocation16]   ;;  %s4250_s2 = smov [#allocation19]  }
  0x7f   :  { %s199_s1 = sshll.u32 %s4249_s14, 4  ;;  %s221_s7 = sshll.u32 %s4250_s2, 4  ;;  %s200_s1 = int_to_ptr.vmem [resolvable:$true] %s199_s1  ;;  %s222_s7 = int_to_ptr.vmem [resolvable:$true] %s221_s7 }
  0x80   :  { %s3792_s10 = scalar_lea.hbm %s4353_s20, 16 }
  0x81   :  { %p3793_p4 = scmp.ne.s32.totalorder %s4353_s20, %s3792_s10  ;;  %p3796_p5 = scmp.lt.u32.totalorder %s3792_s10, %s4353_s20 }
  0x83   :  { %p3798_p6 = pnand %p3796_p5, %p3793_p4 }
  0x85   :  { %3801 = shalt.err (!%p3798_p6)
}
  0x86   :  { %s3802_s11 = scalar_lea.vmem %s200_s1, 16  ;;  %s3806_s15 = scalar_lea.vmem %s200_s1, 32 }
  0x87   :  { %p3803_p7 = scmp.ne.s32.totalorder %s200_s1, %s3802_s11  ;;  %p3807_p8 = scmp.lt.s32.totalorder %s200_s1, %s200_s1 }
  0x88   :  { %p3808_p9 = scmp.lt.s32.totalorder %s3806_s15, %s3802_s11 }
  0x8a   :  { %p3809_p10 = por %p3808_p9, %p3807_p8 }
  0x8c   :  { %p3810_p11 = pnand %p3809_p10, %p3803_p7 }
  0x8e   :  { %3813 = shalt.err (!%p3810_p11)
}
  0x8f   :  { %202 = dma.hbm_to_vmem [thread:$0]  %s4353_s20, 16, %s200_s1, [#allocation17]  }
  0x90   :  { %s3814_s6 = scalar_lea.hbm %s4363_s4, 16 }
  0x91   :  { %p3815_p12 = scmp.ne.s32.totalorder %s4363_s4, %s3814_s6  ;;  %p3818_p13 = scmp.lt.u32.totalorder %s3814_s6, %s4363_s4 }
  0x93   :  { %p3820_p0 = pnand %p3818_p13, %p3815_p12 }
  0x95   :  { %3823 = shalt.err (!%p3820_p0)
}
  0x96   :  { %s3824_s21 = scalar_lea.vmem %s222_s7, 16  ;;  %s3828_s16 = scalar_lea.vmem %s222_s7, 32 }
  0x97   :  { %p3825_p1 = scmp.ne.s32.totalorder %s222_s7, %s3824_s21  ;;  %p3829_p2 = scmp.lt.s32.totalorder %s222_s7, %s222_s7 }
  0x98   :  { %p3830_p3 = scmp.lt.s32.totalorder %s3828_s16, %s3824_s21 }
  0x9a   :  { %p3831_p4 = por %p3830_p3, %p3829_p2 }
  0x9c   :  { %p3832_p5 = pnand %p3831_p4, %p3825_p1 }
  0x9e   :  { %3835 = shalt.err (!%p3832_p5)
}
  0x9f   :  { %224 = dma.hbm_to_vmem [thread:$0]  %s4363_s4, 16, %s222_s7, [#allocation20]  }
  0xa0   :  { %s4251_s18 = smov [#allocation22]   ;;  %s4252_s22 = smov [#allocation25]  }
  0xa1   :  { %s243_s20 = sshll.u32 %s4251_s18, 4  ;;  %s265_s23 = sshll.u32 %s4252_s22, 4  ;;  %s244_s20 = int_to_ptr.vmem [resolvable:$true] %s243_s20  ;;  %s266_s23 = int_to_ptr.vmem [resolvable:$true] %s265_s23 }
  0xa2   :  { %s3836_s0 = scalar_lea.hbm %s4373_s24, 16 }
  0xa3   :  { %p3837_p6 = scmp.ne.s32.totalorder %s4373_s24, %s3836_s0  ;;  %p3840_p7 = scmp.lt.u32.totalorder %s3836_s0, %s4373_s24 }
  0xa5   :  { %p3842_p8 = pnand %p3840_p7, %p3837_p6 }
  0xa7   :  { %3845 = shalt.err (!%p3842_p8)
}
  0xa8   :  { %s3846_s28 = scalar_lea.vmem %s244_s20, 16  ;;  %s3850_s14 = scalar_lea.vmem %s244_s20, 32 }
  0xa9   :  { %p3847_p9 = scmp.ne.s32.totalorder %s244_s20, %s3846_s28  ;;  %p3851_p10 = scmp.lt.s32.totalorder %s244_s20, %s244_s20 }
  0xaa   :  { %p3852_p11 = scmp.lt.s32.totalorder %s3850_s14, %s3846_s28 }
  0xac   :  { %p3853_p12 = por %p3852_p11, %p3851_p10 }
  0xae   :  { %p3854_p13 = pnand %p3853_p12, %p3847_p9 }
  0xb0   :  { %3857 = shalt.err (!%p3854_p13)
}
  0xb1   :  { %246 = dma.hbm_to_vmem [thread:$0]  %s4373_s24, 16, %s244_s20, [#allocation23]  }
  0xb2   :  { %s3858_s4 = scalar_lea.hbm %s4383_s3, 16 }
  0xb3   :  { %p3859_p0 = scmp.ne.s32.totalorder %s4383_s3, %s3858_s4  ;;  %p3862_p1 = scmp.lt.u32.totalorder %s3858_s4, %s4383_s3 }
  0xb5   :  { %p3864_p2 = pnand %p3862_p1, %p3859_p0 }
  0xb7   :  { %3867 = shalt.err (!%p3864_p2)
}
  0xb8   :  { %s3868_s1 = scalar_lea.vmem %s266_s23, 16  ;;  %s3872_s2 = scalar_lea.vmem %s266_s23, 32 }
  0xb9   :  { %p3869_p3 = scmp.ne.s32.totalorder %s266_s23, %s3868_s1  ;;  %p3873_p4 = scmp.lt.s32.totalorder %s266_s23, %s266_s23 }
  0xba   :  { %p3874_p5 = scmp.lt.s32.totalorder %s3872_s2, %s3868_s1 }
  0xbc   :  { %p3875_p6 = por %p3874_p5, %p3873_p4 }
  0xbe   :  { %p3876_p7 = pnand %p3875_p6, %p3869_p3 }
  0xc0   :  { %3879 = shalt.err (!%p3876_p7)
}
  0xc1   :  { %268 = dma.hbm_to_vmem [thread:$0]  %s4383_s3, 16, %s266_s23, [#allocation26]  }
  0xc2   :  { %s4253_s7 = smov [#allocation28]   ;;  %s4254_s10 = smov [#allocation31]  }
  0xc3   :  { %s287_s24 = sshll.u32 %s4253_s7, 4  ;;  %s309_s11 = sshll.u32 %s4254_s10, 4  ;;  %s288_s24 = int_to_ptr.vmem [resolvable:$true] %s287_s24  ;;  %s310_s11 = int_to_ptr.vmem [resolvable:$true] %s309_s11 }
  0xc4   :  { %s3880_s15 = scalar_lea.hbm %s4393_s5, 16 }
  0xc5   :  { %p3881_p8 = scmp.ne.s32.totalorder %s4393_s5, %s3880_s15  ;;  %p3884_p9 = scmp.lt.u32.totalorder %s3880_s15, %s4393_s5 }
  0xc7   :  { %p3886_p10 = pnand %p3884_p9, %p3881_p8 }
  0xc9   :  { %3889 = shalt.err (!%p3886_p10)
}
  0xca   :  { %s3890_s6 = scalar_lea.vmem %s288_s24, 16  ;;  %s3894_s21 = scalar_lea.vmem %s288_s24, 32 }
  0xcb   :  { %p3891_p11 = scmp.ne.s32.totalorder %s288_s24, %s3890_s6  ;;  %p3895_p12 = scmp.lt.s32.totalorder %s288_s24, %s288_s24 }
  0xcc   :  { %p3896_p13 = scmp.lt.s32.totalorder %s3894_s21, %s3890_s6 }
  0xce   :  { %p3897_p0 = por %p3896_p13, %p3895_p12 }
  0xd0   :  { %p3898_p1 = pnand %p3897_p0, %p3891_p11 }
  0xd2   :  { %3901 = shalt.err (!%p3898_p1)
}
  0xd3   :  { %290 = dma.hbm_to_vmem [thread:$0]  %s4393_s5, 16, %s288_s24, [#allocation29]  }
  0xd4   :  { %s3902_s3 = scalar_lea.hbm %s4403_s30, 16 }
  0xd5   :  { %p3903_p2 = scmp.ne.s32.totalorder %s4403_s30, %s3902_s3  ;;  %p3906_p3 = scmp.lt.u32.totalorder %s3902_s3, %s4403_s30 }
  0xd7   :  { %p3908_p4 = pnand %p3906_p3, %p3903_p2 }
  0xd9   :  { %3911 = shalt.err (!%p3908_p4)
}
  0xda   :  { %s3912_s16 = scalar_lea.vmem %s310_s11, 16  ;;  %s3916_s18 = scalar_lea.vmem %s310_s11, 32 }
  0xdb   :  { %p3913_p5 = scmp.ne.s32.totalorder %s310_s11, %s3912_s16  ;;  %p3917_p6 = scmp.lt.s32.totalorder %s310_s11, %s310_s11 }
  0xdc   :  { %p3918_p7 = scmp.lt.s32.totalorder %s3916_s18, %s3912_s16 }
  0xde   :  { %p3919_p8 = por %p3918_p7, %p3917_p6 }
  0xe0   :  { %p3920_p9 = pnand %p3919_p8, %p3913_p5 }
  0xe2   :  { %3923 = shalt.err (!%p3920_p9)
}
  0xe3   :  { %312 = dma.hbm_to_vmem [thread:$0]  %s4403_s30, 16, %s310_s11, [#allocation32]  }
  0xe4   :  { %s4255_s20 = smov [#allocation2]   ;;  %s4256_s22 = smov [#allocation6]  }
  0xe5   :  { %s92_s5 = sshll.u32 %s4255_s20, 4  ;;  %s114_s23 = sshll.u32 %s4256_s22, 4  ;;  %s93_s5 = int_to_ptr.vmem [resolvable:$true] %s92_s5  ;;  %s4488_s23 = int_to_ptr.vmem [resolvable:$true] %s114_s23 }
  0xe6   :  { %s3924_s0 = scalar_lea.hbm %s4293_s17, 1024 }
  0xe7   :  { %p3925_p10 = scmp.ne.s32.totalorder %s4293_s17, %s3924_s0  ;;  %p3928_p11 = scmp.lt.u32.totalorder %s3924_s0, %s4293_s17 }
  0xe9   :  { %p3930_p12 = pnand %p3928_p11, %p3925_p10 }
  0xeb   :  { %3933 = shalt.err (!%p3930_p12)
}
  0xec   :  { %s3934_s28 = scalar_lea.vmem %s93_s5, 1024  ;;  %p3939_p0 = scmp.lt.s32.totalorder %s93_s5, %s93_s5 }
  0xed   :  { %p3935_p13 = scmp.ne.s32.totalorder %s93_s5, %s3934_s28  ;;  %p3940_p1 = scmp.lt.s32.totalorder %s3934_s28, %s3934_s28 }
  0xef   :  { %p3941_p2 = por %p3940_p1, %p3939_p0 }
  0xf1   :  { %p3942_p3 = pnand %p3941_p2, %p3935_p13 }
  0xf3   :  { %3945 = shalt.err (!%p3942_p3)
}
  0xf4   :  { %98 = dma.hbm_to_vmem [thread:$0]  %s4293_s17, 1024, %s93_s5, [#allocation3], %s4247_s29, %s4247_s29, %s4248_s26  }
  0xf5   :  { %s3946_s30 = scalar_lea.hbm %s4303_s25, 1024 }
  0xf6   :  { %p3947_p4 = scmp.ne.s32.totalorder %s4303_s25, %s3946_s30  ;;  %p3950_p5 = scmp.lt.u32.totalorder %s3946_s30, %s4303_s25 }
  0xf8   :  { %p3952_p6 = pnand %p3950_p5, %p3947_p4 }
  0xfa   :  { %3955 = shalt.err (!%p3952_p6)
}
  0xfb   :  { %s3956_s14 = scalar_lea.vmem %s4488_s23, 1024  ;;  %p3961_p8 = scmp.lt.s32.totalorder %s4488_s23, %s4488_s23 }
  0xfc   :  { %p3957_p7 = scmp.ne.s32.totalorder %s4488_s23, %s3956_s14  ;;  %p3962_p9 = scmp.lt.s32.totalorder %s3956_s14, %s3956_s14 }
  0xfe   :  { %p3963_p10 = por %p3962_p9, %p3961_p8 }
 0x100   :  { %p3964_p11 = pnand %p3963_p10, %p3957_p7 }
 0x102   :  { %3967 = shalt.err (!%p3964_p11)
}
 0x103   :  { %120 = dma.hbm_to_vmem [thread:$0]  %s4303_s25, 1024, %s4488_s23, [#allocation5], %s4247_s29, %s4247_s29, %s4248_s26  }
 0x104   :  { %s4257_s17 = smov [#allocation9]   ;;  %s4258_s1 = smov [#allocation12]  }
 0x105   :  { %s139_s4 = sshll.u32 %s4257_s17, 4  ;;  %s161_s2 = sshll.u32 %s4258_s1, 4  ;;  %s140_s4 = int_to_ptr.vmem [resolvable:$true] %s139_s4  ;;  %s162_s2 = int_to_ptr.vmem [resolvable:$true] %s161_s2 }
 0x106   :  { %s3968_s7 = scalar_lea.hbm %s4318_s8, 16 }
 0x107   :  { %p3969_p12 = scmp.ne.s32.totalorder %s4318_s8, %s3968_s7  ;;  %p3972_p13 = scmp.lt.u32.totalorder %s3968_s7, %s4318_s8 }
 0x109   :  { %p3974_p0 = pnand %p3972_p13, %p3969_p12 }
 0x10b   :  { %3977 = shalt.err (!%p3974_p0)
}
 0x10c   :  { %s3978_s24 = scalar_lea.vmem %s140_s4, 16  ;;  %s3982_s10 = scalar_lea.vmem %s140_s4, 32 }
 0x10d   :  { %p3979_p1 = scmp.ne.s32.totalorder %s140_s4, %s3978_s24  ;;  %p3983_p2 = scmp.lt.s32.totalorder %s140_s4, %s140_s4 }
 0x10e   :  { %p3984_p3 = scmp.lt.s32.totalorder %s3982_s10, %s3978_s24 }
 0x110   :  { %p3985_p4 = por %p3984_p3, %p3983_p2 }
 0x112   :  { %p3986_p5 = pnand %p3985_p4, %p3979_p1 }
 0x114   :  { %3989 = shalt.err (!%p3986_p5)
}
 0x115   :  { %142 = dma.hbm_to_vmem [thread:$0]  %s4318_s8, 16, %s140_s4, [#allocation8]  }
 0x116   :  { %s3990_s25 = scalar_lea.hbm %s4328_s19, 16 }
 0x117   :  { %p3991_p6 = scmp.ne.s32.totalorder %s4328_s19, %s3990_s25  ;;  %p3994_p7 = scmp.lt.u32.totalorder %s3990_s25, %s4328_s19 }
 0x119   :  { %p3996_p8 = pnand %p3994_p7, %p3991_p6 }
 0x11b   :  { %3999 = shalt.err (!%p3996_p8)
}
 0x11c   :  { %s4000_s11 = scalar_lea.vmem %s162_s2, 16  ;;  %s4004_s15 = scalar_lea.vmem %s162_s2, 32 }
 0x11d   :  { %p4001_p9 = scmp.ne.s32.totalorder %s162_s2, %s4000_s11  ;;  %p4005_p10 = scmp.lt.s32.totalorder %s162_s2, %s162_s2 }
 0x11e   :  { %p4006_p11 = scmp.lt.s32.totalorder %s4004_s15, %s4000_s11 }
 0x120   :  { %p4007_p12 = por %p4006_p11, %p4005_p10 }
 0x122   :  { %p4008_p13 = pnand %p4007_p12, %p4001_p9 }
 0x124   :  { %4011 = shalt.err (!%p4008_p13)
}
 0x125   :  { %s4969_s6 = sld [smem:[#allocation54_spill]]  ;;  %s4259_s21 = smov [#allocation15]  }
 0x126   :  { %164 = dma.hbm_to_vmem [thread:$0]  %s4328_s19, 16, %s162_s2, [#allocation11]  }
 0x127   :  { %s186_s8 = sshll.u32 %s4259_s21, 4  ;;  %s4260_s3 = smov [#allocation18]   ;;  %s187_s8 = int_to_ptr.vmem [resolvable:$true] %s186_s8 }
 0x128   :  { %s208_s16 = sshll.u32 %s4260_s3, 4  ;;  %s4517_s16 = int_to_ptr.vmem [resolvable:$true] %s208_s16 }
 0x12b   :  { %s4012_s18 = scalar_lea.hbm %s4969_s6, 1024 }
 0x12c   :  { %p4013_p0 = scmp.ne.s32.totalorder %s4969_s6, %s4012_s18  ;;  %p4016_p1 = scmp.lt.u32.totalorder %s4012_s18, %s4969_s6 }
 0x12e   :  { %p4018_p2 = pnand %p4016_p1, %p4013_p0 }
 0x130   :  { %4021 = shalt.err (!%p4018_p2)
}
 0x131   :  { %s4022_s20 = scalar_lea.vmem %s187_s8, 1024  ;;  %p4027_p4 = scmp.lt.s32.totalorder %s187_s8, %s187_s8 }
 0x132   :  { %p4023_p3 = scmp.ne.s32.totalorder %s187_s8, %s4022_s20  ;;  %p4028_p5 = scmp.lt.s32.totalorder %s4022_s20, %s4022_s20 }
 0x134   :  { %p4029_p6 = por %p4028_p5, %p4027_p4 }
 0x136   :  { %p4030_p7 = pnand %p4029_p6, %p4023_p3 }
 0x138   :  { %4033 = shalt.err (!%p4030_p7)
}
 0x139   :  { %s4970_s19 = sld [smem:[#allocation55_spill]] }
 0x13a   :  { %192 = dma.hbm_to_vmem [thread:$0]  %s4969_s6, 1024, %s187_s8, [#allocation14], %s4247_s29, %s4247_s29, %s4248_s26  }
 0x13f   :  { %s4034_s5 = scalar_lea.hbm %s4970_s19, 1024 }
 0x140   :  { %p4035_p8 = scmp.ne.s32.totalorder %s4970_s19, %s4034_s5  ;;  %p4038_p9 = scmp.lt.u32.totalorder %s4034_s5, %s4970_s19 }
 0x142   :  { %p4040_p10 = pnand %p4038_p9, %p4035_p8 }
 0x144   :  { %4043 = shalt.err (!%p4040_p10)
}
 0x145   :  { %s4044_s22 = scalar_lea.vmem %s4517_s16, 1024  ;;  %p4049_p12 = scmp.lt.s32.totalorder %s4517_s16, %s4517_s16 }
 0x146   :  { %p4045_p11 = scmp.ne.s32.totalorder %s4517_s16, %s4044_s22  ;;  %p4050_p13 = scmp.lt.s32.totalorder %s4044_s22, %s4044_s22 }
 0x148   :  { %p4051_p0 = por %p4050_p13, %p4049_p12 }
 0x14a   :  { %p4052_p1 = pnand %p4051_p0, %p4045_p11 }
 0x14c   :  { %4055 = shalt.err (!%p4052_p1)
}
 0x14d   :  { %s4971_s23 = sld [smem:[#allocation56_spill]]  ;;  %s4261_s0 = smov [#allocation21]  }
 0x14e   :  { %214 = dma.hbm_to_vmem [thread:$0]  %s4970_s19, 1024, %s4517_s16, [#allocation17], %s4247_s29, %s4247_s29, %s4248_s26  }
 0x14f   :  { %s230_s28 = sshll.u32 %s4261_s0, 4  ;;  %s4262_s30 = smov [#allocation24]   ;;  %s231_s28 = int_to_ptr.vmem [resolvable:$true] %s230_s28 }
 0x150   :  { %s252_s14 = sshll.u32 %s4262_s30, 4  ;;  %s4538_s14 = int_to_ptr.vmem [resolvable:$true] %s252_s14 }
 0x153   :  { %s4056_s17 = scalar_lea.hbm %s4971_s23, 1024 }
 0x154   :  { %p4057_p2 = scmp.ne.s32.totalorder %s4971_s23, %s4056_s17  ;;  %p4060_p3 = scmp.lt.u32.totalorder %s4056_s17, %s4971_s23 }
 0x156   :  { %p4062_p4 = pnand %p4060_p3, %p4057_p2 }
 0x158   :  { %4065 = shalt.err (!%p4062_p4)
}
 0x159   :  { %s4066_s4 = scalar_lea.vmem %s231_s28, 1024  ;;  %p4071_p6 = scmp.lt.s32.totalorder %s231_s28, %s231_s28 }
 0x15a   :  { %p4067_p5 = scmp.ne.s32.totalorder %s231_s28, %s4066_s4  ;;  %p4072_p7 = scmp.lt.s32.totalorder %s4066_s4, %s4066_s4 }
 0x15c   :  { %p4073_p8 = por %p4072_p7, %p4071_p6 }
 0x15e   :  { %p4074_p9 = pnand %p4073_p8, %p4067_p5 }
 0x160   :  { %4077 = shalt.err (!%p4074_p9)
}
 0x161   :  { %s4972_s1 = sld [smem:[#allocation57_spill]] }
 0x162   :  { %236 = dma.hbm_to_vmem [thread:$0]  %s4971_s23, 1024, %s231_s28, [#allocation20], %s4247_s29, %s4247_s29, %s4248_s26  }
 0x167   :  { %s4078_s2 = scalar_lea.hbm %s4972_s1, 1024 }
 0x168   :  { %p4079_p10 = scmp.ne.s32.totalorder %s4972_s1, %s4078_s2  ;;  %p4082_p11 = scmp.lt.u32.totalorder %s4078_s2, %s4972_s1 }
 0x16a   :  { %p4084_p12 = pnand %p4082_p11, %p4079_p10 }
 0x16c   :  { %4087 = shalt.err (!%p4084_p12)
}
 0x16d   :  { %s4088_s7 = scalar_lea.vmem %s4538_s14, 1024  ;;  %p4093_p0 = scmp.lt.s32.totalorder %s4538_s14, %s4538_s14 }
 0x16e   :  { %p4089_p13 = scmp.ne.s32.totalorder %s4538_s14, %s4088_s7  ;;  %p4094_p1 = scmp.lt.s32.totalorder %s4088_s7, %s4088_s7 }
 0x170   :  { %p4095_p2 = por %p4094_p1, %p4093_p0 }
 0x172   :  { %p4096_p3 = pnand %p4095_p2, %p4089_p13 }
 0x174   :  { %4099 = shalt.err (!%p4096_p3)
}
 0x175   :  { %s4973_s24 = sld [smem:[#allocation58_spill]]  ;;  %s4263_s10 = smov [#allocation27]  }
 0x176   :  { %258 = dma.hbm_to_vmem [thread:$0]  %s4972_s1, 1024, %s4538_s14, [#allocation23], %s4247_s29, %s4247_s29, %s4248_s26  }
 0x177   :  { %s274_s25 = sshll.u32 %s4263_s10, 4  ;;  %s4264_s11 = smov [#allocation30]   ;;  %s275_s25 = int_to_ptr.vmem [resolvable:$true] %s274_s25 }
 0x178   :  { %s296_s15 = sshll.u32 %s4264_s11, 4  ;;  %s4559_s15 = int_to_ptr.vmem [resolvable:$true] %s296_s15 }
 0x17b   :  { %s4100_s6 = scalar_lea.hbm %s4973_s24, 1024 }
 0x17c   :  { %p4101_p4 = scmp.ne.s32.totalorder %s4973_s24, %s4100_s6  ;;  %p4104_p5 = scmp.lt.u32.totalorder %s4100_s6, %s4973_s24 }
 0x17e   :  { %p4106_p6 = pnand %p4104_p5, %p4101_p4 }
 0x180   :  { %4109 = shalt.err (!%p4106_p6)
}
 0x181   :  { %s4110_s21 = scalar_lea.vmem %s275_s25, 1024  ;;  %p4115_p8 = scmp.lt.s32.totalorder %s275_s25, %s275_s25 }
 0x182   :  { %p4111_p7 = scmp.ne.s32.totalorder %s275_s25, %s4110_s21  ;;  %p4116_p9 = scmp.lt.s32.totalorder %s4110_s21, %s4110_s21 }
 0x184   :  { %p4117_p10 = por %p4116_p9, %p4115_p8 }
 0x186   :  { %p4118_p11 = pnand %p4117_p10, %p4111_p7 }
 0x188   :  { %4121 = shalt.err (!%p4118_p11)
}
 0x189   :  { %s4974_s8 = sld [smem:[#allocation59_spill]] }
 0x18a   :  { %280 = dma.hbm_to_vmem [thread:$0]  %s4973_s24, 1024, %s275_s25, [#allocation26], %s4247_s29, %s4247_s29, %s4248_s26  }
 0x18f   :  { %s4122_s3 = scalar_lea.hbm %s4974_s8, 1024 }
 0x190   :  { %p4123_p12 = scmp.ne.s32.totalorder %s4974_s8, %s4122_s3  ;;  %p4126_p13 = scmp.lt.u32.totalorder %s4122_s3, %s4974_s8 }
 0x192   :  { %p4128_p0 = pnand %p4126_p13, %p4123_p12 }
 0x194   :  { %4131 = shalt.err (!%p4128_p0)
}
 0x195   :  { %s4132_s16 = scalar_lea.vmem %s4559_s15, 1024  ;;  %p4137_p2 = scmp.lt.s32.totalorder %s4559_s15, %s4559_s15 }
 0x196   :  { %p4133_p1 = scmp.ne.s32.totalorder %s4559_s15, %s4132_s16  ;;  %p4138_p3 = scmp.lt.s32.totalorder %s4132_s16, %s4132_s16 }
 0x198   :  { %p4139_p4 = por %p4138_p3, %p4137_p2 }
 0x19a   :  { %p4140_p5 = pnand %p4139_p4, %p4133_p1 }
 0x19c   :  { %4143 = shalt.err (!%p4140_p5)
}
 0x19d   :  { %s4975_s18 = sld [smem:[#allocation60_spill]]  ;;  %s4265_s20 = smov [#allocation33]  }
 0x19e   :  { %302 = dma.hbm_to_vmem [thread:$0]  %s4974_s8, 1024, %s4559_s15, [#allocation29], %s4247_s29, %s4247_s29, %s4248_s26  }
 0x19f   :  { %s318_s19 = sshll.u32 %s4265_s20, 4  ;;  %s4266_s5 = smov [#allocation34]   ;;  %s319_s19 = int_to_ptr.vmem [resolvable:$true] %s318_s19 }
 0x1a0   :  { %s331_s22 = sshll.u32 %s4266_s5, 4  ;;  %s332_s22 = int_to_ptr.vmem [resolvable:$true] %s331_s22 }
 0x1a3   :  { %s4144_s23 = scalar_lea.hbm %s4975_s18, 1024 }
 0x1a4   :  { %p4145_p6 = scmp.ne.s32.totalorder %s4975_s18, %s4144_s23  ;;  %p4148_p7 = scmp.lt.u32.totalorder %s4144_s23, %s4975_s18 }
 0x1a6   :  { %p4150_p8 = pnand %p4148_p7, %p4145_p6 }
 0x1a8   :  { %4153 = shalt.err (!%p4150_p8)
}
 0x1a9   :  { %s4154_s0 = scalar_lea.vmem %s319_s19, 1024  ;;  %p4159_p10 = scmp.lt.s32.totalorder %s319_s19, %s319_s19 }
 0x1aa   :  { %p4155_p9 = scmp.ne.s32.totalorder %s319_s19, %s4154_s0  ;;  %p4160_p11 = scmp.lt.s32.totalorder %s4154_s0, %s4154_s0 }
 0x1ac   :  { %p4161_p12 = por %p4160_p11, %p4159_p10 }
 0x1ae   :  { %p4162_p13 = pnand %p4161_p12, %p4155_p9 }
 0x1b0   :  { %4165 = shalt.err (!%p4162_p13)
}
 0x1b1   :  { %s4976_s28 = sld [smem:[#allocation61_spill]] }
 0x1b2   :  { %324 = dma.hbm_to_vmem [thread:$0]  %s4975_s18, 1024, %s319_s19, [#allocation32], %s4247_s29, %s4247_s29, %s4248_s26  }
 0x1b7   :  { %s4166_s30 = scalar_lea.hbm %s4976_s28, 16 }
 0x1b8   :  { %p4167_p0 = scmp.ne.s32.totalorder %s4976_s28, %s4166_s30  ;;  %p4170_p1 = scmp.lt.u32.totalorder %s4166_s30, %s4976_s28 }
 0x1ba   :  { %p4172_p2 = pnand %p4170_p1, %p4167_p0 }
 0x1bc   :  { %4175 = shalt.err (!%p4172_p2)
}
 0x1bd   :  { %s4176_s14 = scalar_lea.vmem %s332_s22, 16  ;;  %s4180_s17 = scalar_lea.vmem %s332_s22, 32 }
 0x1be   :  { %p4177_p3 = scmp.ne.s32.totalorder %s332_s22, %s4176_s14  ;;  %p4181_p4 = scmp.lt.s32.totalorder %s332_s22, %s332_s22 }
 0x1bf   :  { %p4182_p5 = scmp.lt.s32.totalorder %s4180_s17, %s4176_s14 }
 0x1c1   :  { %p4183_p6 = por %p4182_p5, %p4181_p4 }
 0x1c3   :  { %p4184_p7 = pnand %p4183_p6, %p4177_p3 }
 0x1c5   :  { %4187 = shalt.err (!%p4184_p7)
}
 0x1c6   :  { %334 = dma.hbm_to_vmem [thread:$0]  %s4976_s28, 16, %s332_s22, [#allocation35]  }
 0x1c7   :  { %4188 = dma.done.wait [#allocation3], 1024  }
 0x1c8   :  { %4189 = vsyncadd [#allocation3], 4294966272 }
 0x1c9   :  { %4190 = dma.done.wait [#allocation5], 1040  }
 0x1ca   :  { %4191 = vsyncadd [#allocation5], 4294966256 }
 0x1cb   :  { %4192 = dma.done.wait [#allocation8], 32  }
 0x1cc   :  { %4193 = vsyncadd [#allocation8], 4294967264 }
 0x1cd   :  { %4194 = dma.done.wait [#allocation11], 1040  }
 0x1ce   :  { %4195 = vsyncadd [#allocation11], 4294966256 }
 0x1cf   :  { %4196 = dma.done.wait [#allocation14], 2048  }
 0x1d0   :  { %4197 = vsyncadd [#allocation14], 4294965248 }
 0x1d1   :  { %4198 = dma.done.wait [#allocation17], 1040  }
 0x1d2   :  { %4199 = vsyncadd [#allocation17], 4294966256 }
 0x1d3   :  { %4200 = dma.done.wait [#allocation20], 1040  }
 0x1d4   :  { %4201 = vsyncadd [#allocation20], 4294966256 }
 0x1d5   :  { %4202 = dma.done.wait [#allocation23], 1040  }
 0x1d6   :  { %4203 = vsyncadd [#allocation23], 4294966256 }
 0x1d7   :  { %4204 = dma.done.wait [#allocation26], 1040  }
 0x1d8   :  { %4205 = vsyncadd [#allocation26], 4294966256 }
 0x1d9   :  { %4206 = dma.done.wait [#allocation29], 1040  }
 0x1da   :  { %4207 = vsyncadd [#allocation29], 4294966256 }
 0x1db   :  { %4208 = dma.done.wait [#allocation32], 1040  }
 0x1dc   :  { %4209 = vsyncadd [#allocation32], 4294966256 }
 0x1dd   :  { %4210 = dma.done.wait [#allocation35], 16  }
 0x1de   :  { %4211 = vsyncadd [#allocation35], 4294967280  ;;  %s4977_s29 = sld [smem:[#allocation48_spill]]  ;;  %v4267_v0 = vmov 0.0   ;;  %s4978_s26 = sld [smem:[#allocation49_spill]]  ;;  %vm4268_vm0 = vmmov 0  }
 0x1df   :  { %3084 = vmatprep.subr.bf16.mxu0 %v4267_v0  ;;  %3090 = vmatprep.mubr.msk.bf16.mxu0 %vm4268_vm0, %v4267_v0  ;;  %v3596_v4 = vld [vmem:[#allocation2] sm:$0xff]   ;;  %v3597_v5 = vld [vmem:[#allocation2 + $0x8] sm:$0xff]   ;;  %vm447_vm1 = vcmask 392192   ;;  %v3598_v7 = vld [vmem:[#allocation2 + $0x10] sm:$0xff]   ;;  %s4979_s4 = sld [smem:[#allocation51_spill]]  ;;  %s4980_s1 = sld [smem:[#allocation50_spill]] }
 0x1e0   :  { %3102 = vmatprep.subr.bf16.mxu1 %v4267_v0  ;;  %3118 = vmatprep.mubr.msk.bf16.mxu1 %vm4268_vm0, %v4267_v0  ;;  %v3599_v8 = vld [vmem:[#allocation2 + $0x18] sm:$0xff]   ;;  %v3600_v10 = vld [vmem:[#allocation2 + $0x20] sm:$0xff]   ;;  %v3601_v11 = vld [vmem:[#allocation2 + $0x28] sm:$0xff]   ;;  %s4981_s2 = sld [smem:[#allocation52_spill]]  ;;  %vm2375_vm2 = vcmask 1041409   ;;  %vm2377_vm3 = vcmask 1042434  }
 0x1e1   :  { %3103 = vmatpush3.bf16.msra.mxu1 %v3596_v4  ;;  %v3602_v13 = vld [vmem:[#allocation2 + $0x30] sm:$0xff]   ;;  %v3603_v14 = vld [vmem:[#allocation2 + $0x38] sm:$0xff]   ;;  %v3604_v15 = vld [vmem:[#allocation6] sm:$0xff]   ;;  %vm2379_vm4 = vcmask 1043459   ;;  %vm2381_vm5 = vcmask 1044484   ;;  %vm2383_vm6 = vcmask 1045509  }
 0x1e2   :  { %3104 = vmatprep.subr.bf16.mxu1 %v4267_v0  ;;  %v3605_v16 = vld [vmem:[#allocation6 + $0x8] sm:$0xff]   ;;  %v3606_v17 = vld [vmem:[#allocation6 + $0x10] sm:$0xff]   ;;  %v3607_v18 = vld [vmem:[#allocation6 + $0x18] sm:$0xff]   ;;  %vm2385_vm7 = vcmask 1046534   ;;  %vm2387_vm8 = vcmask 1047559   ;;  %vm2391_vm10 = vcmask 64512  }
 0x1e3   :  { %v3608_v19 = vld [vmem:[#allocation6 + $0x20] sm:$0xff]   ;;  %v3609_v20 = vld [vmem:[#allocation6 + $0x28] sm:$0xff]   ;;  %v3610_v36 = vld [vmem:[#allocation6 + $0x30] sm:$0xff]  }
 0x1e4   :  { %v3590_v1 = vld [vmem:[%s4977_s29] sm:$0xff]   ;;  %v3591_v2 = vld [vmem:[%s4977_s29 + $0x8] sm:$0xff]   ;;  %v3592_v3 = vld [vmem:[%s4977_s29 + $0x10] sm:$0xff]  }
 0x1e5   :  { %3085 = vmatpush3.bf16.msra.mxu0 %v3590_v1  ;;  %v4603_v6 = vld [vmem:[%s4978_s26] sm:$0xff]   ;;  %3105 = vmatpush3.bf16.msra.mxu1 %v3597_v5  ;;  %v4613_v9 = vld [vmem:[%s4978_s26 + $0x8] sm:$0xff]   ;;  %v4622_v12 = vld [vmem:[%s4978_s26 + $0x10] sm:$0xff]  }
 0x1e6   :  { %3086 = vmatprep.subr.bf16.mxu0 %v4267_v0  ;;  %3106 = vmatprep.subr.bf16.mxu1 %v4267_v0  ;;  %v3611_v37 = vld [vmem:[#allocation6 + $0x38] sm:$0xff]   ;;  %v3613_v4 = vld [vmem:[%s4979_s4 + $0x8] sm:$0xff]   ;;  %v3614_v5 = vld [vmem:[%s4979_s4 + $0x10] sm:$0xff]  }
 0x1e7   :  { %v2774_v38 = vld [vmem:[#allocation4] ss:$0 sm:$0xff] }
 0x1e9   :  { %3087 = vmatpush3.bf16.msra.mxu0 %v3591_v2  ;;  %3107 = vmatpush3.bf16.msra.mxu1 %v3598_v7  ;;  %v3615_v7 = vld [vmem:[%s4979_s4 + $0x18] sm:$0xff]  }
 0x1ea   :  { %3088 = vmatprep.subr.bf16.mxu0 %v4267_v0  ;;  %3108 = vmatprep.subr.bf16.mxu1 %v4267_v0 }
 0x1ed   :  { %3089 = vmatpush3.bf16.msra.mxu0 %v3592_v3  ;;  %3109 = vmatpush3.bf16.msra.mxu1 %v3599_v8  ;;  %v3612_v3 = vld [vmem:[%s4979_s4] sm:$0xff]  }
 0x1ee   :  { %3130 = vmatprep.subr.bf16.mxu0 %v4267_v0  ;;  %3110 = vmatprep.subr.bf16.mxu1 %v4267_v0  ;;  %v3616_v8 = vld [vmem:[%s4979_s4 + $0x20] sm:$0xff]  }
 0x1f0   :  { %3091 = vmatmul.mubr.msk.bf16.vlgmr.msra.gmra.mrb[0].mxu0 %vm447_vm1, %v4603_v6 }
 0x1f1   :  { %3094 = vmatprep.mubr.msk.bf16.mxu0 %vm4268_vm0, %v4267_v0  ;;  %3111 = vmatpush3.bf16.msra.mxu1 %v3600_v10  ;;  %v3617_v10 = vld [vmem:[%s4979_s4 + $0x28] sm:$0xff]  }
 0x1f2   :  { %3112 = vmatprep.subr.bf16.mxu1 %v4267_v0  ;;  %3131 = vmatpush3.bf16.msra.mxu0 %v3604_v15 }
 0x1f3   :  { %3132 = vmatprep.subr.bf16.mxu0 %v4267_v0 }
 0x1f5   :  { %3113 = vmatpush3.bf16.msra.mxu1 %v3601_v11  ;;  %v3618_v11 = vld [vmem:[%s4979_s4 + $0x30] sm:$0xff]  }
 0x1f6   :  { %3114 = vmatprep.subr.bf16.mxu1 %v4267_v0  ;;  %3133 = vmatpush3.bf16.msra.mxu0 %v3605_v16 }
 0x1f7   :  { %3134 = vmatprep.subr.bf16.mxu0 %v4267_v0 }
 0x1f8   :  { %3095 = vmatmul.mubr.msk.bf16.gmra.mrb[4].mxu0 %vm447_vm1, %v4613_v9 }
 0x1f9   :  { %3098 = vmatprep.mubr.msk.bf16.mxu0 %vm4268_vm0, %v4267_v0  ;;  %3115 = vmatpush3.bf16.msra.mxu1 %v3602_v13  ;;  %v2783_v13 = vld [vmem:[#allocation7] ss:$0 sm:$0xff] }
 0x1fa   :  { %3116 = vmatprep.subr.bf16.mxu1 %v4267_v0  ;;  %3135 = vmatpush3.bf16.msra.mxu0 %v3606_v17 }
 0x1fb   :  { %3136 = vmatprep.subr.bf16.mxu0 %v4267_v0 }
 0x1fd   :  { %3117 = vmatpush3.bf16.msra.mxu1 %v3603_v14 }
 0x1fe   :  { %3158 = vmatprep.subr.bf16.mxu1 %v4267_v0  ;;  %3137 = vmatpush3.bf16.msra.mxu0 %v3607_v18 }
 0x1ff   :  { %3138 = vmatprep.subr.bf16.mxu0 %v4267_v0 }
 0x200   :  { %3099 = vmatmul.mubr.msk.bf16.gmra.mrb[8].mxu0 %vm447_vm1, %v4622_v12 }
 0x201   :  { %3146 = vmatprep.mubr.msk.bf16.mxu0 %vm4268_vm0, %v4267_v0 }
 0x202   :  { %3139 = vmatpush3.bf16.msra.mxu0 %v3608_v19 }
 0x203   :  { %3140 = vmatprep.subr.bf16.mxu0 %v4267_v0 }
 0x206   :  { %3141 = vmatpush3.bf16.msra.mxu0 %v3609_v20 }
 0x207   :  { %3142 = vmatprep.subr.bf16.mxu0 %v4267_v0 }
 0x20a   :  { %3143 = vmatpush3.bf16.msra.mxu0 %v3610_v36 }
 0x20b   :  { %3144 = vmatprep.subr.bf16.mxu0 %v4267_v0 }
 0x20e   :  { %3145 = vmatpush3.bf16.msra.mxu0 %v3611_v37 }
 0x20f   :  { %3176 = vmatprep.subr.bf16.mxu0 %v4267_v0 }
 0x2c3   :  { %v491_v21 = vpop.f32.mrb[0].mxu0 }
 0x2c4   :  { %v3092_v22 = vpop.f32.mrb[1].mxu0 }
 0x2c5   :  { %v494_v23 = vpop.f32.mrb[2].mxu0 }
 0x2c6   :  { %v530_v24 = vpack.c.bf16 %v494_v23, %v491_v21  ;;  %v3093_v25 = vpop.f32.mrb[3].mxu0 }
 0x2c8   :  { %3119 = vmatmul.mubr.bf16.vlgmr.msra.gmra.mrb[0].mxu1 %v530_v24 }
 0x2c9   :  { %3122 = vmatprep.mubr.msk.bf16.mxu1 %vm4268_vm0, %v4267_v0 }
 0x2cb   :  { %v499_v26 = vpop.f32.mrb[4].mxu0 }
 0x2cc   :  { %v3096_v27 = vpop.f32.mrb[5].mxu0 }
 0x2cd   :  { %v502_v28 = vpop.f32.mrb[6].mxu0 }
 0x2ce   :  { %v531_v29 = vpack.c.bf16 %v502_v28, %v499_v26  ;;  %v3097_v30 = vpop.f32.mrb[7].mxu0 }
 0x2d0   :  { %3123 = vmatmul.mubr.bf16.gmra.mrb[4].mxu1 %v531_v29 }
 0x2d1   :  { %3126 = vmatprep.mubr.msk.bf16.mxu1 %vm4268_vm0, %v4267_v0 }
 0x2d3   :  { %v507_v31 = vpop.f32.mrb[8].mxu0 }
 0x2d4   :  { %v3100_v32 = vpop.f32.mrb[9].mxu0 }
 0x2d5   :  { %v510_v33 = vpop.f32.mrb[10].mxu0 }
 0x2d6   :  { %v532_v34 = vpack.c.bf16 %v510_v33, %v507_v31  ;;  %v3101_v35 = vpop.f32.mrb[11].mxu0 }
 0x2d8   :  { %3127 = vmatmul.mubr.bf16.gmra.mrb[8].mxu1 %v532_v34 }
 0x2d9   :  { %3164 = vmatprep.mubr.msk.bf16.mxu1 %vm4268_vm0, %v4267_v0 }
 0x39b   :  { %v622_v39 = vpop.f32.mrb[0].mxu1 }
 0x39c   :  { %v623_v40 = vadd.f32 %v2774_v38, %v622_v39  ;;  %v3120_v41 = vpop.f32.mrb[1].mxu1 }
 0x39d   :  { %v625_v42 = vpop.f32.mrb[2].mxu1  ;;  %v3619_v41 = vld [vmem:[%s4979_s4 + $0x38] sm:$0xff]  }
 0x39e   :  { %v626_v43 = vadd.f32 %v2774_v38, %v625_v42  ;;  %v3121_v44 = vpop.f32.mrb[3].mxu1  ;;  %v645_v45 = vmax.f32 %v623_v40, 0.0  ;;  %v3620_v42 = vld [vmem:[#allocation10] sm:$0xff]  }
 0x39f   :  { %v3625_v44 = vld [vmem:[#allocation10 + $0x28] sm:$0xff]  }
 0x3a0   :  { %v646_v46 = vmax.f32 %v626_v43, 0.0  ;;  %v3622_v43 = vld [vmem:[#allocation10 + $0x10] sm:$0xff]  }
 0x3a2   :  { %v667_v47 = vpack.c.bf16 %v646_v46, %v645_v45 }
 0x3a3   :  { %v630_v48 = vpop.f32.mrb[4].mxu1 }
 0x3a4   :  { %v631_v49 = vadd.f32 %v2774_v38, %v630_v48  ;;  %v3124_v50 = vpop.f32.mrb[5].mxu1  ;;  %3147 = vmatmul.mubr.bf16.vlgmr.msra.gmra.mrb[12].mxu0 %v667_v47 }
 0x3a5   :  { %v633_v51 = vpop.f32.mrb[6].mxu1  ;;  %3150 = vmatprep.mubr.msk.bf16.mxu0 %vm4268_vm0, %v4267_v0  ;;  %3177 = vmatpush3.bf16.msra.mxu0 %v3612_v3 }
 0x3a6   :  { %v634_v52 = vadd.f32 %v2774_v38, %v633_v51  ;;  %v3125_v53 = vpop.f32.mrb[7].mxu1  ;;  %v647_v54 = vmax.f32 %v631_v49, 0.0  ;;  %3178 = vmatprep.subr.bf16.mxu0 %v4267_v0 }
 0x3a8   :  { %v648_v55 = vmax.f32 %v634_v52, 0.0 }
 0x3a9   :  { %3179 = vmatpush3.bf16.msra.mxu0 %v3613_v4 }
 0x3aa   :  { %v668_v56 = vpack.c.bf16 %v648_v55, %v647_v54  ;;  %3180 = vmatprep.subr.bf16.mxu0 %v4267_v0 }
 0x3ab   :  { %v638_v57 = vpop.f32.mrb[8].mxu1 }
 0x3ac   :  { %v639_v58 = vadd.f32 %v2774_v38, %v638_v57  ;;  %v3128_v59 = vpop.f32.mrb[9].mxu1  ;;  %3151 = vmatmul.mubr.bf16.gmra.mrb[16].mxu0 %v668_v56 }
 0x3ad   :  { %v641_v60 = vpop.f32.mrb[10].mxu1  ;;  %3154 = vmatprep.mubr.msk.bf16.mxu0 %vm4268_vm0, %v4267_v0  ;;  %3181 = vmatpush3.bf16.msra.mxu0 %v3614_v5 }
 0x3ae   :  { %v642_v61 = vadd.f32 %v2774_v38, %v641_v60  ;;  %v3129_v62 = vpop.f32.mrb[11].mxu1  ;;  %v649_v63 = vmax.f32 %v639_v58, 0.0  ;;  %3182 = vmatprep.subr.bf16.mxu0 %v4267_v0  ;;  %v3626_v60 = vld [vmem:[#allocation10 + $0x30] sm:$0xff]  }
 0x3af   :  { %v2795_v62 = vld [vmem:[#allocation9] ss:$0 sm:$0xff] }
 0x3b0   :  { %v650_v1 = vmax.f32 %v642_v61, 0.0  ;;  %v3627_v61 = vld [vmem:[#allocation10 + $0x38] sm:$0xff]  }
 0x3b1   :  { %3183 = vmatpush3.bf16.msra.mxu0 %v3615_v7 }
 0x3b2   :  { %v669_v2 = vpack.c.bf16 %v650_v1, %v649_v63  ;;  %3184 = vmatprep.subr.bf16.mxu0 %v4267_v0 }
 0x3b4   :  { %3155 = vmatmul.mubr.bf16.gmra.mrb[20].mxu0 %v669_v2 }
 0x3b5   :  { %3192 = vmatprep.mubr.msk.bf16.mxu0 %vm4268_vm0, %v4267_v0  ;;  %3185 = vmatpush3.bf16.msra.mxu0 %v3616_v8 }
 0x3b6   :  { %3186 = vmatprep.subr.bf16.mxu0 %v4267_v0 }
 0x3b9   :  { %3187 = vmatpush3.bf16.msra.mxu0 %v3617_v10 }
 0x3ba   :  { %3188 = vmatprep.subr.bf16.mxu0 %v4267_v0 }
 0x3bd   :  { %3189 = vmatpush3.bf16.msra.mxu0 %v3618_v11 }
 0x3be   :  { %3190 = vmatprep.subr.bf16.mxu0 %v4267_v0 }
 0x3c1   :  { %3191 = vmatpush3.bf16.msra.mxu0 %v3619_v41 }
 0x477   :  { %v759_v14 = vpop.f32.mrb[12].mxu0 }
 0x478   :  { %v760_v15 = vadd.f32 %v2783_v13, %v759_v14  ;;  %v3148_v16 = vpop.f32.mrb[13].mxu0 }
 0x479   :  { %v762_v17 = vpop.f32.mrb[14].mxu0 }
 0x47a   :  { %v763_v18 = vadd.f32 %v2783_v13, %v762_v17  ;;  %v3149_v19 = vpop.f32.mrb[15].mxu0  ;;  %v782_v20 = vmax.f32 %v760_v15, 0.0 }
 0x47c   :  { %v783_v21 = vmax.f32 %v763_v18, 0.0 }
 0x47e   :  { %v788_v22 = vpack.c.bf16 %v783_v21, %v782_v20 }
 0x47f   :  { %v767_v23 = vpop.f32.mrb[16].mxu0 }
 0x480   :  { %v768_v24 = vadd.f32 %v2783_v13, %v767_v23  ;;  %v3152_v25 = vpop.f32.mrb[17].mxu0  ;;  %3159 = vmatpush3.bf16.msra.mxu1 %v788_v22 }
 0x481   :  { %v770_v26 = vpop.f32.mrb[18].mxu0  ;;  %3160 = vmatprep.subr.bf16.mxu1 %v4267_v0 }
 0x482   :  { %v771_v27 = vadd.f32 %v2783_v13, %v770_v26  ;;  %v3153_v28 = vpop.f32.mrb[19].mxu0  ;;  %v784_v29 = vmax.f32 %v768_v24, 0.0 }
 0x484   :  { %v785_v30 = vmax.f32 %v771_v27, 0.0 }
 0x486   :  { %v789_v31 = vpack.c.bf16 %v785_v30, %v784_v29  ;;  %v1116_v30 = vld [vmem:[%s4980_s1] sm:$0xff] }
 0x487   :  { %v775_v32 = vpop.f32.mrb[20].mxu0 }
 0x488   :  { %v776_v33 = vadd.f32 %v2783_v13, %v775_v32  ;;  %v3156_v34 = vpop.f32.mrb[21].mxu0  ;;  %3161 = vmatpush3.bf16.msra.mxu1 %v789_v31  ;;  %v3628_v31 = vld [vmem:[#allocation15] sm:$0xff]   ;;  %v3630_v32 = vld [vmem:[#allocation15 + $0x8] sm:$0xff]  }
 0x489   :  { %v778_v35 = vpop.f32.mrb[22].mxu0  ;;  %3162 = vmatprep.subr.bf16.mxu1 %v4267_v0  ;;  %v3634_v34 = vld [vmem:[#allocation15 + $0x18] sm:$0xff]  }
 0x48a   :  { %v779_v36 = vadd.f32 %v2783_v13, %v778_v35  ;;  %v3157_v37 = vpop.f32.mrb[23].mxu0  ;;  %v786_v38 = vmax.f32 %v776_v33, 0.0  ;;  %v3632_v33 = vld [vmem:[#allocation15 + $0x10] sm:$0xff]   ;;  %v3636_v35 = vld [vmem:[#allocation15 + $0x20] sm:$0xff]  }
 0x48b   :  { %v3640_v37 = vld [vmem:[#allocation15 + $0x30] sm:$0xff]  }
 0x48c   :  { %v787_v39 = vmax.f32 %v779_v36, 0.0  ;;  %v3638_v36 = vld [vmem:[#allocation15 + $0x28] sm:$0xff]  }
 0x48e   :  { %v790_v40 = vpack.c.bf16 %v787_v39, %v786_v38  ;;  %v3642_v38 = vld [vmem:[#allocation15 + $0x38] sm:$0xff]  }
 0x48f   :  { %v2804_v39 = vld [vmem:[#allocation12] ss:$0 sm:$0xff] }
 0x490   :  { %3163 = vmatpush3.bf16.msra.mxu1 %v790_v40 }
 0x491   :  { %3204 = vmatprep.subr.bf16.mxu1 %v4267_v0 }
 0x493   :  { %3165 = vmatmul.mubr.msk.bf16.vlgmr.msra.gmra.mrb[12].mxu1 %vm447_vm1, %v4603_v6  ;;  %v3621_v6 = vld [vmem:[#allocation10 + $0x8] sm:$0xff]  }
 0x494   :  { %3168 = vmatprep.mubr.msk.bf16.mxu1 %vm4268_vm0, %v4267_v0  ;;  %3205 = vmatpush3.bf16.msra.mxu1 %v3620_v42 }
 0x495   :  { %3206 = vmatprep.subr.bf16.mxu1 %v4267_v0 }
 0x498   :  { %3207 = vmatpush3.bf16.msra.mxu1 %v3621_v6 }
 0x499   :  { %3208 = vmatprep.subr.bf16.mxu1 %v4267_v0 }
 0x49b   :  { %3169 = vmatmul.mubr.msk.bf16.gmra.mrb[16].mxu1 %vm447_vm1, %v4613_v9  ;;  %v3623_v9 = vld [vmem:[#allocation10 + $0x18] sm:$0xff]  }
 0x49c   :  { %3172 = vmatprep.mubr.msk.bf16.mxu1 %vm4268_vm0, %v4267_v0  ;;  %3209 = vmatpush3.bf16.msra.mxu1 %v3622_v43 }
 0x49d   :  { %3210 = vmatprep.subr.bf16.mxu1 %v4267_v0 }
 0x4a0   :  { %3211 = vmatpush3.bf16.msra.mxu1 %v3623_v9 }
 0x4a1   :  { %3212 = vmatprep.subr.bf16.mxu1 %v4267_v0 }
 0x4a3   :  { %3173 = vmatmul.mubr.msk.bf16.gmra.mrb[20].mxu1 %vm447_vm1, %v4622_v12  ;;  %v3624_v12 = vld [vmem:[#allocation10 + $0x20] sm:$0xff]  }
 0x4a4   :  { %3220 = vmatprep.mubr.msk.bf16.mxu1 %vm4268_vm0, %v4267_v0  ;;  %3213 = vmatpush3.bf16.msra.mxu1 %v3624_v12 }
 0x4a5   :  { %3214 = vmatprep.subr.bf16.mxu1 %v4267_v0 }
 0x4a8   :  { %3215 = vmatpush3.bf16.msra.mxu1 %v3625_v44 }
 0x4a9   :  { %3216 = vmatprep.subr.bf16.mxu1 %v4267_v0 }
 0x4ac   :  { %3217 = vmatpush3.bf16.msra.mxu1 %v3626_v60  ;;  %v3631_v60 = vld [vmem:[#allocation13 + $0x8] sm:$0xff]  }
 0x4ad   :  { %3218 = vmatprep.subr.bf16.mxu1 %v4267_v0 }
 0x4b0   :  { %3219 = vmatpush3.bf16.msra.mxu1 %v3627_v61  ;;  %v3633_v61 = vld [vmem:[#allocation13 + $0x10] sm:$0xff]  }
 0x4b1   :  { %3247 = vmatprep.subr.bf16.mxu1 %v4267_v0 }
 0x566   :  { %v825_v45 = vpop.f32.mrb[12].mxu1 }
 0x567   :  { %v3166_v46 = vpop.f32.mrb[13].mxu1 }
 0x568   :  { %v828_v47 = vpop.f32.mrb[14].mxu1 }
 0x569   :  { %v864_v48 = vpack.c.bf16 %v828_v47, %v825_v45  ;;  %v3167_v49 = vpop.f32.mrb[15].mxu1 }
 0x56b   :  { %3193 = vmatmul.mubr.bf16.vlgmr.msra.gmra.mrb[24].mxu0 %v864_v48 }
 0x56c   :  { %3196 = vmatprep.mubr.msk.bf16.mxu0 %vm4268_vm0, %v4267_v0 }
 0x56e   :  { %v833_v50 = vpop.f32.mrb[16].mxu1 }
 0x56f   :  { %v3170_v51 = vpop.f32.mrb[17].mxu1 }
 0x570   :  { %v836_v52 = vpop.f32.mrb[18].mxu1 }
 0x571   :  { %v865_v53 = vpack.c.bf16 %v836_v52, %v833_v50  ;;  %v3171_v54 = vpop.f32.mrb[19].mxu1 }
 0x573   :  { %3197 = vmatmul.mubr.bf16.gmra.mrb[28].mxu0 %v865_v53 }
 0x574   :  { %3200 = vmatprep.mubr.msk.bf16.mxu0 %vm4268_vm0, %v4267_v0 }
 0x576   :  { %v841_v55 = vpop.f32.mrb[20].mxu1 }
 0x577   :  { %v3174_v56 = vpop.f32.mrb[21].mxu1 }
 0x578   :  { %v844_v57 = vpop.f32.mrb[22].mxu1 }
 0x579   :  { %v866_v58 = vpack.c.bf16 %v844_v57, %v841_v55  ;;  %v3175_v59 = vpop.f32.mrb[23].mxu1 }
 0x57a   :  { %v3629_v59 = vld [vmem:[#allocation13] sm:$0xff]  }
 0x57b   :  { %3201 = vmatmul.mubr.bf16.gmra.mrb[32].mxu0 %v866_v58  ;;  %v1117_v58 = vld [vmem:[%s4980_s1 + $0x8] sm:$0xff] }
 0x57c   :  { %3244 = vmatprep.mubr.msk.f32.mxu0 %vm447_vm1, %v1116_v30  ;;  %v4790_v30 = vld [vmem:[#allocation21 + $0x30] sm:$0xff]  }
 0x63e   :  { %v956_v63 = vpop.f32.mrb[24].mxu0 }
 0x63f   :  { %v957_v1 = vadd.f32 %v2795_v62, %v956_v63  ;;  %v3194_v2 = vpop.f32.mrb[25].mxu0  ;;  %v3637_v63 = vld [vmem:[#allocation13 + $0x20] sm:$0xff]  }
 0x640   :  { %v959_v3 = vpop.f32.mrb[26].mxu0  ;;  %v3641_v2 = vld [vmem:[#allocation13 + $0x30] sm:$0xff]  }
 0x641   :  { %v960_v4 = vadd.f32 %v2795_v62, %v959_v3  ;;  %v3195_v5 = vpop.f32.mrb[27].mxu0  ;;  %v979_v7 = vmax.f32 %v957_v1, 0.0  ;;  %v3639_v1 = vld [vmem:[#allocation13 + $0x28] sm:$0xff]   ;;  %v1199_v3 = vld [vmem:[%s4981_s2] sm:$0x1] }
 0x642   :  { %v4726_v5 = vld [vmem:[#allocation18] sm:$0xff]  }
 0x643   :  { %v980_v8 = vmax.f32 %v960_v4, 0.0  ;;  %v3643_v4 = vld [vmem:[#allocation13 + $0x38] sm:$0xff]  }
 0x645   :  { %v1001_v10 = vpack.c.bf16 %v980_v8, %v979_v7  ;;  %v4729_v7 = vld [vmem:[#allocation18 + $0x8] sm:$0xff]   ;;  %v4733_v8 = vld [vmem:[#allocation18 + $0x10] sm:$0xff]  }
 0x646   :  { %v964_v11 = vpop.f32.mrb[28].mxu0 }
 0x647   :  { %v965_v13 = vadd.f32 %v2795_v62, %v964_v11  ;;  %v3198_v14 = vpop.f32.mrb[29].mxu0  ;;  %3221 = vmatmul.mubr.bf16.vlgmr.msra.gmra.mrb[24].mxu1 %v1001_v10  ;;  %v4737_v10 = vld [vmem:[#allocation18 + $0x18] sm:$0xff]   ;;  %v4741_v11 = vld [vmem:[#allocation18 + $0x20] sm:$0xff]  }
 0x648   :  { %v967_v15 = vpop.f32.mrb[30].mxu0  ;;  %3224 = vmatprep.mubr.msk.bf16.mxu1 %vm4268_vm0, %v4267_v0  ;;  %3248 = vmatpush3.bf16.msra.mxu1 %v3628_v31  ;;  %v4750_v14 = vld [vmem:[#allocation18 + $0x30] sm:$0xff]   ;;  %v1322_v31 = vlaneseq }
 0x649   :  { %v968_v16 = vadd.f32 %v2795_v62, %v967_v15  ;;  %v3199_v17 = vpop.f32.mrb[31].mxu0  ;;  %v981_v18 = vmax.f32 %v965_v13, 0.0  ;;  %3249 = vmatprep.subr.bf16.mxu1 %v4267_v0  ;;  %v4745_v13 = vld [vmem:[#allocation18 + $0x28] sm:$0xff]  }
 0x64b   :  { %v982_v19 = vmax.f32 %v968_v16, 0.0 }
 0x64c   :  { %3250 = vmatpush3.bf16.msra.mxu1 %v3630_v32  ;;  %v4796_v32 = vshrl.u32 %v1322_v31, 7 }
 0x64d   :  { %v1002_v20 = vpack.c.bf16 %v982_v19, %v981_v18  ;;  %3251 = vmatprep.subr.bf16.mxu1 %v4267_v0 }
 0x64e   :  { %v972_v21 = vpop.f32.mrb[32].mxu0 }
 0x64f   :  { %v973_v22 = vadd.f32 %v2795_v62, %v972_v21  ;;  %v3202_v23 = vpop.f32.mrb[33].mxu0  ;;  %3225 = vmatmul.mubr.bf16.gmra.mrb[28].mxu1 %v1002_v20 }
 0x650   :  { %v975_v24 = vpop.f32.mrb[34].mxu0  ;;  %3228 = vmatprep.mubr.msk.bf16.mxu1 %vm4268_vm0, %v4267_v0  ;;  %3252 = vmatpush3.bf16.msra.mxu1 %v3632_v33  ;;  %v3651_v23 = vld [vmem:[#allocation18 + $0x38] sm:$0xff]  }
 0x651   :  { %v976_v25 = vadd.f32 %v2795_v62, %v975_v24  ;;  %v3203_v26 = vpop.f32.mrb[35].mxu0  ;;  %v983_v27 = vmax.f32 %v973_v22, 0.0  ;;  %3253 = vmatprep.subr.bf16.mxu1 %v4267_v0  ;;  %v3635_v62 = vld [vmem:[#allocation13 + $0x18] sm:$0xff]   ;;  %v4767_v24 = vld [vmem:[#allocation21] sm:$0xff]   ;;  %v1216_v33 = vld [vmem:[#allocation16] sm:$0x1] }
 0x652   :  { %v4774_v26 = vld [vmem:[#allocation21 + $0x10] sm:$0xff]  }
 0x653   :  { %v984_v28 = vmax.f32 %v976_v25, 0.0  ;;  %v4770_v25 = vld [vmem:[#allocation21 + $0x8] sm:$0xff]  }
 0x654   :  { %3254 = vmatpush3.bf16.msra.mxu1 %v3634_v34 }
 0x655   :  { %v1003_v29 = vpack.c.bf16 %v984_v28, %v983_v27  ;;  %3255 = vmatprep.subr.bf16.mxu1 %v4267_v0  ;;  %v4778_v27 = vld [vmem:[#allocation21 + $0x18] sm:$0xff]   ;;  %v4782_v28 = vld [vmem:[#allocation21 + $0x20] sm:$0xff]  }
 0x657   :  { %3229 = vmatmul.mubr.bf16.gmra.mrb[32].mxu1 %v1003_v29  ;;  %v4786_v29 = vld [vmem:[#allocation21 + $0x28] sm:$0xff]  }
 0x658   :  { %3263 = vmatprep.mubr.msk.bf16.mxu1 %vm4268_vm0, %v4267_v0  ;;  %3256 = vmatpush3.bf16.msra.mxu1 %v3636_v35  ;;  %v4799_v35 = vsub.s32 0, %v4796_v32 }
 0x659   :  { %3257 = vmatprep.subr.bf16.mxu1 %v4267_v0 }
 0x65c   :  { %3258 = vmatpush3.bf16.msra.mxu1 %v3638_v36 }
 0x65d   :  { %3259 = vmatprep.subr.bf16.mxu1 %v4267_v0 }
 0x660   :  { %3260 = vmatpush3.bf16.msra.mxu1 %v3640_v37 }
 0x661   :  { %3261 = vmatprep.subr.bf16.mxu1 %v4267_v0 }
 0x664   :  { %3262 = vmatpush3.bf16.msra.mxu1 %v3642_v38 }
 0x665   :  { %3287 = vmatprep.subr.bf16.mxu1 %v4267_v0 }
 0x667   :  { %3264 = vmatmul.mubr.bf16.vlgmr.msra.gmra.mrb[36].mxu1 %v1199_v3 }
 0x668   :  { %3303 = vmatprep.mubr.msk.bf16.mxu1 %vm4268_vm0, %v4267_v0  ;;  %3288 = vmatpush3.bf16.msra.mxu1 %v4726_v5 }
 0x669   :  { %3289 = vmatprep.subr.bf16.mxu1 %v4267_v0 }
 0x66c   :  { %3290 = vmatpush3.bf16.msra.mxu1 %v4729_v7 }
 0x66d   :  { %3291 = vmatprep.subr.bf16.mxu1 %v4267_v0 }
 0x670   :  { %3292 = vmatpush3.bf16.msra.mxu1 %v4733_v8 }
 0x671   :  { %3293 = vmatprep.subr.bf16.mxu1 %v4267_v0 }
 0x674   :  { %3294 = vmatpush3.bf16.msra.mxu1 %v4737_v10 }
 0x675   :  { %3295 = vmatprep.subr.bf16.mxu1 %v4267_v0 }
 0x678   :  { %3296 = vmatpush3.bf16.msra.mxu1 %v4741_v11 }
 0x679   :  { %3297 = vmatprep.subr.bf16.mxu1 %v4267_v0 }
 0x67c   :  { %3298 = vmatpush3.bf16.msra.mxu1 %v4745_v13 }
 0x67d   :  { %3299 = vmatprep.subr.bf16.mxu1 %v4267_v0 }
 0x680   :  { %3300 = vmatpush3.bf16.msra.mxu1 %v4750_v14 }
 0x681   :  { %3301 = vmatprep.subr.bf16.mxu1 %v4267_v0 }
 0x684   :  { %3302 = vmatpush3.bf16.msra.mxu1 %v3651_v23 }
 0x685   :  { %3327 = vmatprep.subr.bf16.mxu1 %v4267_v0 }
 0x71a   :  { %v1093_v40 = vpop.f32.mrb[24].mxu1 }
 0x71b   :  { %v3222_v41 = vpop.f32.mrb[25].mxu1  ;;  %v1094_v6 = vadd.f32 %v2804_v39, %v1093_v40 }
 0x71c   :  { %v1096_v42 = vpop.f32.mrb[26].mxu1 }
 0x71d   :  { %v1097_v43 = vadd.f32 %v2804_v39, %v1096_v42  ;;  %v3223_v9 = vpop.f32.mrb[27].mxu1 }
 0x71f   :  { %v3520_v12 = vpack.c.bf16 %v1097_v43, %v1094_v6 }
 0x721   :  { %3521 = vmatprep.subr.bf16.mxu0 %v3520_v12 }
 0x722   :  { %v1101_v44 = vpop.f32.mrb[28].mxu1  ;;  %3523 = vmatpush3.bf16.msra.mxu0 %v3520_v12 }
 0x723   :  { %v3226_v45 = vpop.f32.mrb[29].mxu1  ;;  %v1102_v47 = vadd.f32 %v2804_v39, %v1101_v44 }
 0x724   :  { %v1104_v46 = vpop.f32.mrb[30].mxu1 }
 0x725   :  { %v1105_v48 = vadd.f32 %v2804_v39, %v1104_v46  ;;  %v3227_v49 = vpop.f32.mrb[31].mxu1 }
 0x726   :  { %v4822_v49 = vld [vmem:[#allocation24] sm:$0xff]  }
 0x727   :  { %v3524_v50 = vpack.c.bf16 %v1105_v48, %v1102_v47  ;;  %v3659_v48 = vld [vmem:[#allocation21 + $0x38] sm:$0xff]  }
 0x729   :  { %3525 = vmatprep.subr.bf16.mxu0 %v3524_v50 }
 0x72a   :  { %v1109_v51 = vpop.f32.mrb[32].mxu1  ;;  %3527 = vmatpush3.bf16.msra.mxu0 %v3524_v50  ;;  %v4825_v50 = vld [vmem:[#allocation24 + $0x8] sm:$0xff]  }
 0x72b   :  { %v3230_v52 = vpop.f32.mrb[33].mxu1  ;;  %v1110_v54 = vadd.f32 %v2804_v39, %v1109_v51  ;;  %v4829_v51 = vld [vmem:[#allocation24 + $0x10] sm:$0xff]  }
 0x72c   :  { %v1112_v53 = vpop.f32.mrb[34].mxu1  ;;  %v4833_v52 = vld [vmem:[#allocation24 + $0x18] sm:$0xff]  }
 0x72d   :  { %v1113_v55 = vadd.f32 %v2804_v39, %v1112_v53  ;;  %v3231_v56 = vpop.f32.mrb[35].mxu1  ;;  %v4837_v53 = vld [vmem:[#allocation24 + $0x20] sm:$0xff]  }
 0x72e   :  { %v2831_v56 = vld [vmem:[#allocation19] ss:$0 sm:$0xff] }
 0x72f   :  { %v3528_v57 = vpack.c.bf16 %v1113_v55, %v1110_v54  ;;  %v3665_v54 = vld [vmem:[#allocation24 + $0x28] sm:$0xff]   ;;  %v3666_v55 = vld [vmem:[#allocation24 + $0x30] sm:$0xff]  }
 0x731   :  { %3529 = vmatprep.subr.bf16.mxu0 %v3528_v57 }
 0x732   :  { %3531 = vmatpush3.bf16.msra.mxu0 %v3528_v57 }
 0x733   :  { %3267 = vmatprep.subr.bf16.mxu0 %v4267_v0 }
 0x735   :  { %3245 = vmatmul.mubr.msk.f32.vlgmr.msra.gmra.mrb[36].mxu0 %vm447_vm1, %v1117_v58 }
 0x736   :  { %3268 = vmatpush3.bf16.msra.mxu0 %v3629_v59  ;;  %3283 = vmatprep.mubr.msk.bf16.mxu0 %vm4268_vm0, %v4267_v0 }
 0x737   :  { %3269 = vmatprep.subr.bf16.mxu0 %v4267_v0 }
 0x73a   :  { %3270 = vmatpush3.bf16.msra.mxu0 %v3631_v60  ;;  %v1299_v19 = vpop.f32.mrb[36].mxu1 }
 0x73b   :  { %3271 = vmatprep.subr.bf16.mxu0 %v4267_v0  ;;  %v3265_v20 = vpop.f32.mrb[37].mxu1  ;;  %v1300_v34 = vadd.f32 %v1299_v19, %v1216_v33  ;;  %v3672_v33 = vld [vmem:[#allocation27 + $0x20] sm:$0xff]  }
 0x73c   :  { %v1302_v21 = vpop.f32.mrb[38].mxu1 }
 0x73d   :  { %v3266_v22 = vpop.f32.mrb[39].mxu1  ;;  %v1325_v36 = vrot.slane %v1300_v34, %v4799_v35  ;;  %v3673_v34 = vld [vmem:[#allocation27 + $0x28] sm:$0xff]  }
 0x73e   :  { %3272 = vmatpush3.bf16.msra.mxu0 %v3633_v61 }
 0x73f   :  { %3273 = vmatprep.subr.bf16.mxu0 %v4267_v0 }
 0x742   :  { %3274 = vmatpush3.bf16.msra.mxu0 %v3635_v62 }
 0x743   :  { %3275 = vmatprep.subr.bf16.mxu0 %v4267_v0 }
 0x746   :  { %3276 = vmatpush3.bf16.msra.mxu0 %v3637_v63 }
 0x747   :  { %3277 = vmatprep.subr.bf16.mxu0 %v4267_v0 }
 0x74a   :  { %3278 = vmatpush3.bf16.msra.mxu0 %v3639_v1 }
 0x74b   :  { %3279 = vmatprep.subr.bf16.mxu0 %v4267_v0 }
 0x74e   :  { %3280 = vmatpush3.bf16.msra.mxu0 %v3641_v2 }
 0x74f   :  { %3281 = vmatprep.subr.bf16.mxu0 %v4267_v0 }
 0x752   :  { %3282 = vmatpush3.bf16.msra.mxu0 %v3643_v4 }
 0x753   :  { %3307 = vmatprep.subr.bf16.mxu0 %v4267_v0 }
 0x808   :  { %v3246_v15 = vpop.f32.mrb[36].mxu0 }
 0x809   :  { %v1190_v16 = vpop.f32.mrb[37].mxu0  ;;  %v1528_v18 = vpack.c.bf16 %v3246_v15, %v3246_v15 }
 0x80a   :  { %v1321_v17 = vpack.c.bf16 %v1190_v16, %v1190_v16 }
 0x80c   :  { %3284 = vmatmul.mubr.bf16.vlgmr.msra.gmra.mrb[40].mxu0 %v1321_v17 }
 0x80d   :  { %3308 = vmatpush3.bf16.msra.mxu0 %v3629_v59  ;;  %3323 = vmatprep.mubr.msk.bf16.mxu0 %vm4268_vm0, %v4267_v0 }
 0x80e   :  { %3309 = vmatprep.subr.bf16.mxu0 %v4267_v0 }
 0x811   :  { %3310 = vmatpush3.bf16.msra.mxu0 %v3631_v60 }
 0x812   :  { %3311 = vmatprep.subr.bf16.mxu0 %v4267_v0 }
 0x815   :  { %3312 = vmatpush3.bf16.msra.mxu0 %v3633_v61 }
 0x816   :  { %3313 = vmatprep.subr.bf16.mxu0 %v4267_v0 }
 0x819   :  { %3314 = vmatpush3.bf16.msra.mxu0 %v3635_v62 }
 0x81a   :  { %3315 = vmatprep.subr.bf16.mxu0 %v4267_v0 }
 0x81d   :  { %3316 = vmatpush3.bf16.msra.mxu0 %v3637_v63 }
 0x81e   :  { %3317 = vmatprep.subr.bf16.mxu0 %v4267_v0 }
 0x821   :  { %3318 = vmatpush3.bf16.msra.mxu0 %v3639_v1 }
 0x822   :  { %3319 = vmatprep.subr.bf16.mxu0 %v4267_v0 }
 0x825   :  { %3320 = vmatpush3.bf16.msra.mxu0 %v3641_v2 }
 0x826   :  { %3321 = vmatprep.subr.bf16.mxu0 %v4267_v0 }
 0x829   :  { %3322 = vmatpush3.bf16.msra.mxu0 %v3643_v4 }
 0x82a   :  { %3347 = vmatprep.subr.bf16.mxu0 %v4267_v0 }
 0x82c   :  { %3324 = vmatmul.mubr.bf16.vlgmr.msra.gmra.mrb[44].mxu0 %v1528_v18 }
 0x82d   :  { %3363 = vmatprep.mubr.msk.bf16.mxu0 %vm4268_vm0, %v4267_v0  ;;  %3348 = vmatpush3.bf16.msra.mxu0 %v4767_v24 }
 0x82e   :  { %3349 = vmatprep.subr.bf16.mxu0 %v4267_v0 }
 0x831   :  { %3350 = vmatpush3.bf16.msra.mxu0 %v4770_v25 }
 0x832   :  { %3351 = vmatprep.subr.bf16.mxu0 %v4267_v0 }
 0x835   :  { %3352 = vmatpush3.bf16.msra.mxu0 %v4774_v26 }
 0x836   :  { %3353 = vmatprep.subr.bf16.mxu0 %v4267_v0 }
 0x839   :  { %3354 = vmatpush3.bf16.msra.mxu0 %v4778_v27 }
 0x83a   :  { %3355 = vmatprep.subr.bf16.mxu0 %v4267_v0 }
 0x83d   :  { %3356 = vmatpush3.bf16.msra.mxu0 %v4782_v28 }
 0x83e   :  { %3357 = vmatprep.subr.bf16.mxu0 %v4267_v0 }
 0x841   :  { %3358 = vmatpush3.bf16.msra.mxu0 %v4786_v29 }
 0x842   :  { %3359 = vmatprep.subr.bf16.mxu0 %v4267_v0 }
 0x845   :  { %3360 = vmatpush3.bf16.msra.mxu0 %v4790_v30 }
 0x846   :  { %3361 = vmatprep.subr.bf16.mxu0 %v4267_v0 }
 0x849   :  { %3362 = vmatpush3.bf16.msra.mxu0 %v3659_v48 }
 0x84a   :  { %3387 = vmatprep.subr.bf16.mxu0 %v4267_v0 }
 0x8df   :  { %v1408_v37 = vpop.f32.mrb[40].mxu0 }
 0x8e0   :  { %v1409_v38 = vadd.f32 %v1408_v37, %v1325_v36  ;;  %v3285_v39 = vpop.f32.mrb[41].mxu0  ;;  %v3675_v37 = vld [vmem:[#allocation27 + $0x38] sm:$0xff]  }
 0x8e1   :  { %v1411_v40 = vpop.f32.mrb[42].mxu0  ;;  %v3677_v39 = vld [vmem:[#allocation30 + $0x8] sm:$0xff]  }
 0x8e2   :  { %v1414_v41 = vmax.f32 %v1409_v38, 0.0  ;;  %v3286_v42 = vpop.f32.mrb[43].mxu0  ;;  %v3676_v38 = vld [vmem:[#allocation30] sm:$0xff]   ;;  %v3678_v40 = vld [vmem:[#allocation30 + $0x10] sm:$0xff]  }
 0x8e3   :  { %v3680_v42 = vld [vmem:[#allocation30 + $0x20] sm:$0xff]  }
 0x8e4   :  { %v1431_v6 = vpack.c.bf16 %v1414_v41, %v1414_v41  ;;  %v3679_v41 = vld [vmem:[#allocation30 + $0x18] sm:$0xff]  }
 0x8e6   :  { %3304 = vmatmul.mubr.bf16.vlgmr.msra.gmra.mrb[40].mxu1 %v1431_v6  ;;  %v3681_v6 = vld [vmem:[#allocation30 + $0x28] sm:$0xff]  }
 0x8e7   :  { %3328 = vmatpush3.bf16.msra.mxu1 %v4726_v5  ;;  %3343 = vmatprep.mubr.msk.bf16.mxu1 %vm4268_vm0, %v4267_v0 }
 0x8e8   :  { %3329 = vmatprep.subr.bf16.mxu1 %v4267_v0 }
 0x8eb   :  { %3330 = vmatpush3.bf16.msra.mxu1 %v4729_v7 }
 0x8ec   :  { %3331 = vmatprep.subr.bf16.mxu1 %v4267_v0 }
 0x8ef   :  { %3332 = vmatpush3.bf16.msra.mxu1 %v4733_v8 }
 0x8f0   :  { %3333 = vmatprep.subr.bf16.mxu1 %v4267_v0 }
 0x8f3   :  { %3334 = vmatpush3.bf16.msra.mxu1 %v4737_v10  ;;  %v3667_v10 = vld [vmem:[#allocation24 + $0x38] sm:$0xff]  }
 0x8f4   :  { %3335 = vmatprep.subr.bf16.mxu1 %v4267_v0 }
 0x8f7   :  { %3336 = vmatpush3.bf16.msra.mxu1 %v4741_v11  ;;  %v2840_v11 = vld [vmem:[#allocation22] ss:$0 sm:$0xff] }
 0x8f8   :  { %3337 = vmatprep.subr.bf16.mxu1 %v4267_v0 }
 0x8fb   :  { %3338 = vmatpush3.bf16.msra.mxu1 %v4745_v13 }
 0x8fc   :  { %3339 = vmatprep.subr.bf16.mxu1 %v4267_v0 }
 0x8ff   :  { %v1563_v43 = vpop.f32.mrb[44].mxu0  ;;  %3340 = vmatpush3.bf16.msra.mxu1 %v4750_v14 }
 0x900   :  { %v1564_v9 = vadd.f32 %v1563_v43, %v1325_v36  ;;  %v3325_v12 = vpop.f32.mrb[45].mxu0  ;;  %3341 = vmatprep.subr.bf16.mxu1 %v4267_v0  ;;  %v3674_v36 = vld [vmem:[#allocation27 + $0x30] sm:$0xff]   ;;  %v2849_v43 = vld [vmem:[#allocation25] ss:$0 sm:$0xff] }
 0x901   :  { %v1566_v44 = vpop.f32.mrb[46].mxu0 }
 0x902   :  { %v1569_v45 = vmax.f32 %v1564_v9, 0.0  ;;  %v3326_v46 = vpop.f32.mrb[47].mxu0 }
 0x903   :  { %3342 = vmatpush3.bf16.msra.mxu1 %v3651_v23 }
 0x904   :  { %v1570_v47 = vpack.c.bf16 %v1569_v45, %v1569_v45  ;;  %3367 = vmatprep.subr.bf16.mxu1 %v4267_v0 }
 0x906   :  { %3344 = vmatmul.mubr.bf16.vlgmr.msra.gmra.mrb[44].mxu1 %v1570_v47 }
 0x907   :  { %3383 = vmatprep.mubr.msk.bf16.mxu1 %vm4268_vm0, %v4267_v0  ;;  %3368 = vmatpush3.bf16.msra.mxu1 %v4822_v49 }
 0x908   :  { %3369 = vmatprep.subr.bf16.mxu1 %v4267_v0 }
 0x90b   :  { %3370 = vmatpush3.bf16.msra.mxu1 %v4825_v50 }
 0x90c   :  { %3371 = vmatprep.subr.bf16.mxu1 %v4267_v0 }
 0x90f   :  { %3372 = vmatpush3.bf16.msra.mxu1 %v4829_v51 }
 0x910   :  { %3373 = vmatprep.subr.bf16.mxu1 %v4267_v0 }
 0x913   :  { %3374 = vmatpush3.bf16.msra.mxu1 %v4833_v52 }
 0x914   :  { %3375 = vmatprep.subr.bf16.mxu1 %v4267_v0 }
 0x917   :  { %3376 = vmatpush3.bf16.msra.mxu1 %v4837_v53 }
 0x918   :  { %3377 = vmatprep.subr.bf16.mxu1 %v4267_v0 }
 0x91b   :  { %3378 = vmatpush3.bf16.msra.mxu1 %v3665_v54 }
 0x91c   :  { %3379 = vmatprep.subr.bf16.mxu1 %v4267_v0 }
 0x91f   :  { %3380 = vmatpush3.bf16.msra.mxu1 %v3666_v55 }
 0x920   :  { %3381 = vmatprep.subr.bf16.mxu1 %v4267_v0 }
 0x923   :  { %3382 = vmatpush3.bf16.msra.mxu1 %v3667_v10 }
 0x924   :  { %3407 = vmatprep.subr.bf16.mxu1 %v4267_v0 }
 0x9b9   :  { %v1521_v57 = vpop.f32.mrb[40].mxu1 }
 0x9ba   :  { %v1522_v58 = vadd.f32 %v2831_v56, %v1521_v57  ;;  %v3305_v59 = vpop.f32.mrb[41].mxu1 }
 0x9bb   :  { %v1524_v60 = vpop.f32.mrb[42].mxu1 }
 0x9bc   :  { %v1527_v61 = vmax.f32 %v1522_v58, 0.0  ;;  %v3306_v62 = vpop.f32.mrb[43].mxu1 }
 0x9be   :  { %v1628_v63 = vpack.c.bf16 %v1527_v61, %v1527_v61 }
 0x9c0   :  { %3364 = vmatmul.mubr.bf16.vlgmr.msra.gmra.mrb[48].mxu0 %v1628_v63 }
 0x9c1   :  { %3388 = vmatpush3.bf16.msra.mxu0 %v4767_v24  ;;  %3403 = vmatprep.mubr.msk.bf16.mxu0 %vm4268_vm0, %v4267_v0 }
 0x9c2   :  { %3389 = vmatprep.subr.bf16.mxu0 %v4267_v0 }
 0x9c5   :  { %3390 = vmatpush3.bf16.msra.mxu0 %v4770_v25 }
 0x9c6   :  { %3391 = vmatprep.subr.bf16.mxu0 %v4267_v0 }
 0x9c9   :  { %3392 = vmatpush3.bf16.msra.mxu0 %v4774_v26 }
 0x9ca   :  { %3393 = vmatprep.subr.bf16.mxu0 %v4267_v0 }
 0x9cd   :  { %3394 = vmatpush3.bf16.msra.mxu0 %v4778_v27  ;;  %v3668_v27 = vld [vmem:[#allocation27] sm:$0xff]  }
 0x9ce   :  { %3395 = vmatprep.subr.bf16.mxu0 %v4267_v0 }
 0x9d1   :  { %3396 = vmatpush3.bf16.msra.mxu0 %v4782_v28  ;;  %v3669_v28 = vld [vmem:[#allocation27 + $0x8] sm:$0xff]  }
 0x9d2   :  { %3397 = vmatprep.subr.bf16.mxu0 %v4267_v0 }
 0x9d5   :  { %3398 = vmatpush3.bf16.msra.mxu0 %v4786_v29  ;;  %v3670_v29 = vld [vmem:[#allocation27 + $0x10] sm:$0xff]  }
 0x9d6   :  { %3399 = vmatprep.subr.bf16.mxu0 %v4267_v0 }
 0x9d9   :  { %v1605_v1 = vpop.f32.mrb[44].mxu1  ;;  %3400 = vmatpush3.bf16.msra.mxu0 %v4790_v30  ;;  %v3671_v30 = vld [vmem:[#allocation27 + $0x18] sm:$0xff]  }
 0x9da   :  { %v1606_v2 = vadd.f32 %v2831_v56, %v1605_v1  ;;  %v3345_v3 = vpop.f32.mrb[45].mxu1  ;;  %3401 = vmatprep.subr.bf16.mxu0 %v4267_v0 }
 0x9db   :  { %v1608_v4 = vpop.f32.mrb[46].mxu1 }
 0x9dc   :  { %v1611_v5 = vmax.f32 %v1606_v2, 0.0  ;;  %v3346_v7 = vpop.f32.mrb[47].mxu1 }
 0x9dd   :  { %3402 = vmatpush3.bf16.msra.mxu0 %v3659_v48  ;;  %v4269_v48 = vmov 1966171168  }
 0x9de   :  { %v1838_v8 = vpack.c.bf16 %v1611_v5, %v1611_v5  ;;  %3427 = vmatprep.subr.bf16.mxu0 %v3668_v27 }
 0x9e0   :  { %3404 = vmatmul.mubr.bf16.vlgmr.msra.gmra.mrb[52].mxu0 %v1838_v8 }
 0x9e1   :  { %3428 = vmatpush3.bf16.msra.mxu0 %v3668_v27 }
 0x9e2   :  { %3429 = vmatprep.subr.bf16.mxu0 %v3669_v28 }
 0x9e5   :  { %3430 = vmatpush3.bf16.msra.mxu0 %v3669_v28 }
 0x9e6   :  { %3431 = vmatprep.subr.bf16.mxu0 %v3670_v29 }
 0x9e9   :  { %3432 = vmatpush3.bf16.msra.mxu0 %v3670_v29 }
 0x9ea   :  { %3433 = vmatprep.subr.bf16.mxu0 %v3671_v30 }
 0x9ed   :  { %3434 = vmatpush3.bf16.msra.mxu0 %v3671_v30 }
 0x9ee   :  { %3435 = vmatprep.subr.bf16.mxu0 %v3672_v33 }
 0x9f1   :  { %3436 = vmatpush3.bf16.msra.mxu0 %v3672_v33 }
 0x9f2   :  { %3437 = vmatprep.subr.bf16.mxu0 %v3673_v34 }
 0x9f5   :  { %3438 = vmatpush3.bf16.msra.mxu0 %v3673_v34 }
 0x9f6   :  { %3439 = vmatprep.subr.bf16.mxu0 %v3674_v36 }
 0x9f9   :  { %3440 = vmatpush3.bf16.msra.mxu0 %v3674_v36 }
 0x9fa   :  { %3441 = vmatprep.subr.bf16.mxu0 %v3675_v37 }
 0x9fd   :  { %3442 = vmatpush3.bf16.msra.mxu0 %v3675_v37 }
 0x9fe   :  { %3475 = vmatprep.subr.mxu0 %v4267_v0 }
 0xa93   :  { %v1718_v13 = vpop.f32.mrb[48].mxu0 }
 0xa94   :  { %v1719_v14 = vadd.f32 %v2840_v11, %v1718_v13  ;;  %v3365_v15 = vpop.f32.mrb[49].mxu0 }
 0xa95   :  { %v1721_v16 = vpop.f32.mrb[50].mxu0 }
 0xa96   :  { %v1724_v17 = vmax.f32 %v1719_v14, 0.0  ;;  %v3366_v18 = vpop.f32.mrb[51].mxu0 }
 0xa98   :  { %v1741_v19 = vpack.c.bf16 %v1724_v17, %v1724_v17 }
 0xa9a   :  { %3384 = vmatmul.mubr.bf16.vlgmr.msra.gmra.mrb[48].mxu1 %v1741_v19 }
 0xa9b   :  { %3408 = vmatpush3.bf16.msra.mxu1 %v4822_v49  ;;  %3423 = vmatprep.mubr.msk.bf16.mxu1 %vm4268_vm0, %v4267_v0  ;;  %v1925_v49 = vunpack.c.l.s4 %v4269_v48 }
 0xa9c   :  { %3409 = vmatprep.subr.bf16.mxu1 %v4267_v0 }
 0xa9f   :  { %3410 = vmatpush3.bf16.msra.mxu1 %v4825_v50  ;;  %v1926_v50 = vunpack.c.0.s8 %v1925_v49 }
 0xaa0   :  { %3411 = vmatprep.subr.bf16.mxu1 %v4267_v0 }
 0xaa3   :  { %3412 = vmatpush3.bf16.msra.mxu1 %v4829_v51 }
 0xaa4   :  { %3413 = vmatprep.subr.bf16.mxu1 %v4267_v0 }
 0xaa7   :  { %3414 = vmatpush3.bf16.msra.mxu1 %v4833_v52 }
 0xaa8   :  { %3415 = vmatprep.subr.bf16.mxu1 %v4267_v0 }
 0xaab   :  { %3416 = vmatpush3.bf16.msra.mxu1 %v4837_v53  ;;  %v1929_v53 = vsub.s32 %v1926_v50, %v4796_v32 }
 0xaac   :  { %3417 = vmatprep.subr.bf16.mxu1 %v4267_v0 }
 0xaaf   :  { %3418 = vmatpush3.bf16.msra.mxu1 %v3665_v54 }
 0xab0   :  { %3419 = vmatprep.subr.bf16.mxu1 %v4267_v0 }
 0xab3   :  { %v1873_v20 = vpop.f32.mrb[52].mxu0  ;;  %3420 = vmatpush3.bf16.msra.mxu1 %v3666_v55 }
 0xab4   :  { %v1874_v21 = vadd.f32 %v2840_v11, %v1873_v20  ;;  %v3405_v22 = vpop.f32.mrb[53].mxu0  ;;  %3421 = vmatprep.subr.bf16.mxu1 %v4267_v0 }
 0xab5   :  { %v1876_v23 = vpop.f32.mrb[54].mxu0 }
 0xab6   :  { %v1879_v24 = vmax.f32 %v1874_v21, 0.0  ;;  %v3406_v25 = vpop.f32.mrb[55].mxu0 }
 0xab7   :  { %3422 = vmatpush3.bf16.msra.mxu1 %v3667_v10 }
 0xab8   :  { %v1880_v26 = vpack.c.bf16 %v1879_v24, %v1879_v24  ;;  %3451 = vmatprep.subr.bf16.mxu1 %v3676_v38 }
 0xaba   :  { %3424 = vmatmul.mubr.bf16.vlgmr.msra.gmra.mrb[52].mxu1 %v1880_v26 }
 0xabb   :  { %3452 = vmatpush3.bf16.msra.mxu1 %v3676_v38 }
 0xabc   :  { %3453 = vmatprep.subr.bf16.mxu1 %v3677_v39 }
 0xabf   :  { %3454 = vmatpush3.bf16.msra.mxu1 %v3677_v39 }
 0xac0   :  { %3455 = vmatprep.subr.bf16.mxu1 %v3678_v40 }
 0xac3   :  { %3456 = vmatpush3.bf16.msra.mxu1 %v3678_v40 }
 0xac4   :  { %3457 = vmatprep.subr.bf16.mxu1 %v3679_v41 }
 0xac7   :  { %3458 = vmatpush3.bf16.msra.mxu1 %v3679_v41 }
 0xac8   :  { %3459 = vmatprep.subr.bf16.mxu1 %v3680_v42 }
 0xacb   :  { %3460 = vmatpush3.bf16.msra.mxu1 %v3680_v42  ;;  %v3683_v42 = vld [vmem:[#allocation30 + $0x38] sm:$0xff]  }
 0xacc   :  { %3461 = vmatprep.subr.bf16.mxu1 %v3681_v6 }
 0xacf   :  { %3462 = vmatpush3.bf16.msra.mxu1 %v3681_v6  ;;  %v2858_v6 = vld [vmem:[#allocation28] ss:$0 sm:$0xff] }
 0xb6d   :  { %v1831_v9 = vpop.f32.mrb[48].mxu1 }
 0xb6e   :  { %v1832_v12 = vadd.f32 %v2849_v43, %v1831_v9  ;;  %v3385_v44 = vpop.f32.mrb[49].mxu1 }
 0xb6f   :  { %v1834_v45 = vpop.f32.mrb[50].mxu1 }
 0xb70   :  { %v4876_v46 = vmax.f32 %v1832_v12, 0.0  ;;  %v3386_v47 = vpop.f32.mrb[51].mxu1 }
 0xb72   :  { %2704 = vst [vmem:[%s4428_s9] sm:$0xff] %v4876_v46  ;;  %s4982_s9 = sld [smem:[#allocation53_spill]] }
 0xb8d   :  { %v1915_v51 = vpop.f32.mrb[52].mxu1 }
 0xb8e   :  { %v1916_v52 = vadd.f32 %v2849_v43, %v1915_v51  ;;  %v3425_v54 = vpop.f32.mrb[53].mxu1 }
 0xb8f   :  { %v1918_v55 = vpop.f32.mrb[54].mxu1 }
 0xb90   :  { %v4881_v56 = vmax.f32 %v1916_v52, 0.0  ;;  %v3426_v57 = vpop.f32.mrb[55].mxu1 }
 0xb92   :  { %v1923_v58 = vcombine.high %v4881_v56, %v4881_v56  ;;  %v1930_v59 = vrot.slane %v4881_v56, %v1929_v53  ;;  %2705 = vst [vmem:[%s4433_s27] sm:$0xff] %v4881_v56 }
 0xb94   :  { %v1937_v60 = vrot.slane %v1923_v58, %v1929_v53  ;;  %v1938_v61 = vcombine.high %v1930_v59, %v1930_v59  ;;  %v1946_v62 = vrot.slane %v1930_v59, %v1929_v53  ;;  %v3684_v58 = vld [vmem:[#allocation33] sm:$0xff]  }
 0xb96   :  { %v1960_v63 = vrot.slane %v1938_v61, %v1929_v53  ;;  %v1968_v1 = vcombine.high %v1946_v62, %v1946_v62  ;;  %v1975_v2 = vrot.slane %v1946_v62, %v4799_v35  ;;  %v1939_v3 = vcombine.high %v1937_v60, %v1937_v60 }
 0xb97   :  { %v1953_v4 = vrot.slane %v1937_v60, %v1929_v53 }
 0xb98   :  { %v1970_v5 = vcombine.high %v1960_v63, %v1960_v63  ;;  %v1979_v7 = vrot.slane %v1960_v63, %v4799_v35  ;;  %v2012_v8 = vsub.f32 %v4876_v46, %v1975_v2  ;;  %v1983_v10 = vrot.slane %v1968_v1, %v4799_v35 }
 0xb99   :  { %v1967_v11 = vrot.slane %v1939_v3, %v1929_v53  ;;  %v1991_v13 = vrot.slane %v1953_v4, %v4799_v35  ;;  %v1969_v14 = vcombine.high %v1953_v4, %v1953_v4  ;;  %v3685_v3 = vld [vmem:[#allocation33 + $0x8] sm:$0xff]  }
 0xb9a   :  { %v2013_v15 = vsub.f32 %v4876_v46, %v1979_v7  ;;  %v1987_v16 = vrot.slane %v1970_v5, %v4799_v35  ;;  %v2014_v17 = vsub.f32 %v4876_v46, %v1983_v10  ;;  %v2020_v22 = vand.u32 2147483647, %v2012_v8 }
 0xb9b   :  { %v1995_v18 = vrot.slane %v1967_v11, %v4799_v35  ;;  %v2016_v19 = vsub.f32 %v4876_v46, %v1991_v13  ;;  %v1971_v20 = vcombine.high %v1967_v11, %v1967_v11  ;;  %v1999_v21 = vrot.slane %v1969_v14, %v4799_v35  ;;  %v3686_v13 = vld [vmem:[#allocation33 + $0x10] sm:$0xff]   ;;  %v3687_v14 = vld [vmem:[#allocation33 + $0x18] sm:$0xff]  }
 0xb9c   :  { %v2021_v23 = vand.u32 2147483647, %v2013_v15  ;;  %v2015_v24 = vsub.f32 %v4876_v46, %v1987_v16  ;;  %v2022_v29 = vand.u32 2147483647, %v2014_v17  ;;  %v3688_v15 = vld [vmem:[#allocation33 + $0x20] sm:$0xff]   ;;  %v3689_v16 = vld [vmem:[#allocation33 + $0x28] sm:$0xff]  }
 0xb9d   :  { %v2017_v25 = vsub.f32 %v4876_v46, %v1995_v18  ;;  %v2003_v26 = vrot.slane %v1971_v20, %v4799_v35  ;;  %v2018_v27 = vsub.f32 %v4876_v46, %v1999_v21  ;;  %v2024_v33 = vand.u32 2147483647, %v2016_v19  ;;  %v3682_v35 = vld [vmem:[#allocation30 + $0x30] sm:$0xff]   ;;  %v3691_v18 = vld [vmem:[#allocation33 + $0x38] sm:$0xff]  }
 0xb9e   :  { %v2044_v28 = vpack.c.bf16 %v2021_v23, %v2020_v22  ;;  %v2023_v30 = vand.u32 2147483647, %v2015_v24  ;;  %3463 = vmatprep.subr.bf16.mxu1 %v3682_v35  ;;  %v3690_v17 = vld [vmem:[#allocation33 + $0x30] sm:$0xff]   ;;  %v2607_v19 = vpack.c.bf16 %v4876_v46, %v4876_v46  ;;  %v2867_v20 = vld [vmem:[#allocation31] ss:$0 sm:$0xff] }
 0xb9f   :  { %v2025_v34 = vand.u32 2147483647, %v2017_v25  ;;  %v2019_v36 = vsub.f32 %v4876_v46, %v2003_v26  ;;  %v2026_v39 = vand.u32 2147483647, %v2018_v27  ;;  %3464 = vmatpush3.bf16.msra.mxu1 %v3682_v35 }
 0xba0   :  { %3443 = vmatprep.mubr.bf16.mxu0 %v2044_v28  ;;  %v2045_v37 = vpack.c.bf16 %v2023_v30, %v2022_v29  ;;  %3465 = vmatprep.subr.bf16.mxu1 %v3683_v42 }
 0xba1   :  { %v2046_v38 = vpack.c.bf16 %v2025_v34, %v2024_v33  ;;  %v2027_v40 = vand.u32 2147483647, %v2019_v36 }
 0xba2   :  { %3444 = vmatmul.mubr.bf16.vlgmr.msra.gmra.mrb[56].mxu0 %v2045_v37 }
 0xba3   :  { %3447 = vmatprep.mubr.bf16.mxu0 %v2046_v38  ;;  %v2047_v41 = vpack.c.bf16 %v2027_v40, %v2026_v39  ;;  %3466 = vmatpush3.bf16.msra.mxu1 %v3683_v42  ;;  %v4918_v39 = vld [vmem:[#allocation34] ss:$0 sm:$0xff] }
 0xba4   :  { %3500 = vmatprep.subr.bf16.mxu1 %v4267_v0 }
 0xbaa   :  { %3448 = vmatmul.mubr.bf16.gmra.mrb[60].mxu0 %v2047_v41 }
 0xbab   :  { %3477 = vmatprep.mubr.msk.f32.mxu0 %vm4268_vm0, %v4267_v0 }
 0xc75   :  { %v3445_v43 = vpop.f32.mrb[56].mxu0 }
 0xc76   :  { %v2146_v9 = vadd.f32 %v3445_v43, %v2858_v6  ;;  %v2137_v12 = vpop.f32.mrb[57].mxu0  ;;  %v2333_v43 = vand.u32 127, %v1322_v31 }
 0xc77   :  { %v2138_v44 = vadd.f32 %v2858_v6, %v2137_v12  ;;  %v3446_v45 = vpop.f32.mrb[58].mxu0 }
 0xc78   :  { %v2149_v47 = vadd.f32 %v3446_v45, %v2858_v6  ;;  %v2140_v48 = vpop.f32.mrb[59].mxu0  ;;  %v2170_v50 = vmax.f32 %v2146_v9, 0.0  ;;  %vm2334_vm9 = vcmp.lt.s32.totalorder %v2333_v43, 4 }
 0xc79   :  { %v2141_v49 = vadd.f32 %v2858_v6, %v2140_v48  ;;  %v2168_v52 = vmax.f32 %v2138_v44, 0.0  ;;  %v2345_v44 = vsub.s32 %v2333_v43, %v4796_v32 }
 0xc7a   :  { %v2171_v51 = vmax.f32 %v2149_v47, 0.0 }
 0xc7b   :  { %v2169_v53 = vmax.f32 %v2141_v49, 0.0 }
 0xc7c   :  { %v2193_v54 = vpack.c.bf16 %v2171_v51, %v2170_v50 }
 0xc7d   :  { %v2192_v55 = vpack.c.bf16 %v2169_v53, %v2168_v52  ;;  %v3449_v57 = vpop.f32.mrb[60].mxu0 }
 0xc7e   :  { %v2162_v59 = vadd.f32 %v3449_v57, %v2858_v6  ;;  %v2153_v60 = vpop.f32.mrb[61].mxu0 }
 0xc7f   :  { %v2154_v61 = vadd.f32 %v2858_v6, %v2153_v60  ;;  %v3450_v62 = vpop.f32.mrb[62].mxu0  ;;  %3467 = vmatprep.mubr.bf16.mxu1 %v2192_v55 }
 0xc80   :  { %v2165_v63 = vadd.f32 %v3450_v62, %v2858_v6  ;;  %v2156_v1 = vpop.f32.mrb[63].mxu0  ;;  %3468 = vmatmul.mubr.bf16.vlgmr.msra.gmra.mrb[56].mxu1 %v2193_v54  ;;  %v2174_v4 = vmax.f32 %v2162_v59, 0.0 }
 0xc81   :  { %v2157_v2 = vadd.f32 %v2858_v6, %v2156_v1  ;;  %3501 = vmatpush3.bf16.msra.mxu1 %v3684_v58  ;;  %v2172_v7 = vmax.f32 %v2154_v61, 0.0 }
 0xc82   :  { %v2175_v5 = vmax.f32 %v2165_v63, 0.0  ;;  %3502 = vmatprep.subr.bf16.mxu1 %v4267_v0 }
 0xc83   :  { %v2173_v8 = vmax.f32 %v2157_v2, 0.0 }
 0xc84   :  { %v2195_v10 = vpack.c.bf16 %v2175_v5, %v2174_v4 }
 0xc85   :  { %v2194_v11 = vpack.c.bf16 %v2173_v8, %v2172_v7  ;;  %3503 = vmatpush3.bf16.msra.mxu1 %v3685_v3 }
 0xc86   :  { %3504 = vmatprep.subr.bf16.mxu1 %v4267_v0 }
 0xc87   :  { %3471 = vmatprep.mubr.bf16.mxu1 %v2194_v11 }
 0xc88   :  { %3472 = vmatmul.mubr.bf16.gmra.mrb[60].mxu1 %v2195_v10 }
 0xc89   :  { %3505 = vmatpush3.bf16.msra.mxu1 %v3686_v13  ;;  %3516 = vmatprep.mubr.msk.bf16.mxu1 %vm4268_vm0, %v4267_v0  ;;  %v2403_v13 = vld [vmem:[%s4982_s9] sm:$0xff] }
 0xc8a   :  { %3506 = vmatprep.subr.bf16.mxu1 %v4267_v0  ;;  %3476 = vmatpush3.msra.mxu0 %v2403_v13 }
 0xc8b   :  { %3480 = vmatprep.subr.bf16.mxu0 %v4267_v0 }
 0xc8d   :  { %3507 = vmatpush3.bf16.msra.mxu1 %v3687_v14 }
 0xc8e   :  { %3508 = vmatprep.subr.bf16.mxu1 %v4267_v0 }
 0xc91   :  { %3509 = vmatpush3.bf16.msra.mxu1 %v3688_v15 }
 0xc92   :  { %3510 = vmatprep.subr.bf16.mxu1 %v4267_v0 }
 0xc95   :  { %3511 = vmatpush3.bf16.msra.mxu1 %v3689_v16  ;;  %v3692_v16 = vld [vmem:[#allocation33] sm:$0xff]  }
 0xc96   :  { %3512 = vmatprep.subr.bf16.mxu1 %v4267_v0 }
 0xc99   :  { %3513 = vmatpush3.bf16.msra.mxu1 %v3690_v17 }
 0xc9a   :  { %3514 = vmatprep.subr.bf16.mxu1 %v4267_v0 }
 0xc9d   :  { %3515 = vmatpush3.bf16.msra.mxu1 %v3691_v18  ;;  %v3693_v18 = vld [vmem:[#allocation33 + $0x8] sm:$0xff]  }
 0xca0   :  { %3517 = vmatmul.mubr.bf16.vlgmr.msra.gmra.mrb[64].mxu1 %v2607_v19  ;;  %v3694_v19 = vld [vmem:[#allocation33 + $0x10] sm:$0xff]  }
 0xd53   :  { %v3469_v21 = vpop.f32.mrb[56].mxu1 }
 0xd54   :  { %v2285_v22 = vpop.f32.mrb[57].mxu1  ;;  %v2294_v23 = vadd.f32 %v3469_v21, %v2867_v20  ;;  %v3696_v21 = vld [vmem:[#allocation33 + $0x20] sm:$0xff]  }
 0xd55   :  { %v3470_v24 = vpop.f32.mrb[58].mxu1  ;;  %v2286_v25 = vadd.f32 %v2867_v20, %v2285_v22  ;;  %v3697_v22 = vld [vmem:[#allocation33 + $0x28] sm:$0xff]  }
 0xd56   :  { %2320 = vadd.xlane.f32.xlu1 %v2294_v23  ;;  %v2288_v26 = vpop.f32.mrb[59].mxu1  ;;  %v2297_v27 = vadd.f32 %v3470_v24, %v2867_v20  ;;  %v3698_v23 = vld [vmem:[#allocation33 + $0x30] sm:$0xff]   ;;  %v3699_v24 = vld [vmem:[#allocation33 + $0x38] sm:$0xff]  }
 0xd57   :  { %2316 = vadd.xlane.f32.xlu0 %v2286_v25  ;;  %v2289_v28 = vadd.f32 %v2867_v20, %v2288_v26  ;;  %v2493_v25 = vpack.c.bf16 %v4881_v56, %v4881_v56 }
 0xd5a   :  { %2322 = vadd.xlane.f32.xlu1 %v2297_v27 }
 0xd5b   :  { %v3473_v29 = vpop.f32.mrb[60].mxu1  ;;  %2318 = vadd.xlane.f32.xlu0 %v2289_v28 }
 0xd5c   :  { %v2301_v30 = vpop.f32.mrb[61].mxu1  ;;  %v2310_v37 = vadd.f32 %v3473_v29, %v2867_v20 }
 0xd5d   :  { %v2302_v33 = vadd.f32 %v2867_v20, %v2301_v30  ;;  %v3474_v34 = vpop.f32.mrb[62].mxu1 }
 0xd5e   :  { %v2304_v46 = vpop.f32.mrb[63].mxu1  ;;  %v2313_v38 = vadd.f32 %v3474_v34, %v2867_v20 }
 0xd5f   :  { %v2305_v36 = vadd.f32 %v2867_v20, %v2304_v46  ;;  %2324 = vadd.xlane.f32.xlu0 %v2302_v33  ;;  %v3695_v20 = vld [vmem:[#allocation33 + $0x18] sm:$0xff]  }
 0xd61   :  { %2326 = vadd.xlane.f32.xlu1 %v2305_v36 }
 0xd63   :  { %2328 = vadd.xlane.f32.xlu0 %v2310_v37 }
 0xd65   :  { %2330 = vadd.xlane.f32.xlu1 %v2313_v38 }
 0xd73   :  { %v2697_v40 = vpop.f32.mrb[64].mxu1 }
 0xd74   :  { %v2698_v41 = vadd.f32 %v4918_v39, %v2697_v40  ;;  %v3518_v35 = vpop.f32.mrb[65].mxu1 }
 0xd75   :  { %v2700_v42 = vpop.f32.mrb[66].mxu1 }
 0xd76   :  { %2703 = vst [vmem:[%s4418_s13] sm:$0xff] %v2698_v41  ;;  %v3519_v6 = vpop.f32.mrb[67].mxu1 }
 0xde3   :  { %v2321_v9 = vpop.xlane.xlu1 %2320 }
 0xde4   :  { %v2317_v12 = vpop.xlane.xlu0 %2316  ;;  %v2354_v50 = vrot.slane %v2321_v9, %v2345_v44 }
 0xde5   :  { %v2346_v48 = vrot.slane %v2317_v12, %v2345_v44 }
 0xde7   :  { %v2323_v45 = vpop.xlane.xlu1 %2322 }
 0xde8   :  { %v2319_v47 = vpop.xlane.xlu0 %2318  ;;  %v2358_v51 = vrot.slane %v2323_v45, %v2345_v44 }
 0xde9   :  { %v2350_v49 = vrot.slane %v2319_v47, %v2345_v44 }
 0xdeb   :  { %v2376_v52 = vsel %vm2375_vm2, %v2350_v49, %v2346_v48 }
 0xdec   :  { %v2378_v53 = vsel %vm2377_vm3, %v2354_v50, %v2376_v52  ;;  %v2325_v54 = vpop.xlane.xlu0 %2324 }
 0xded   :  { %v2380_v55 = vsel %vm2379_vm4, %v2358_v51, %v2378_v53  ;;  %v2362_v57 = vrot.slane %v2325_v54, %v2345_v44 }
 0xdee   :  { %v2327_v31 = vpop.xlane.xlu1 %2326 }
 0xdef   :  { %v2382_v58 = vsel %vm2381_vm5, %v2362_v57, %v2380_v55  ;;  %v2366_v59 = vrot.slane %v2327_v31, %v2345_v44 }
 0xdf0   :  { %v2329_v32 = vpop.xlane.xlu0 %2328 }
 0xdf1   :  { %v2384_v60 = vsel %vm2383_vm6, %v2366_v59, %v2382_v58  ;;  %v2370_v61 = vrot.slane %v2329_v32, %v2345_v44 }
 0xdf2   :  { %v2331_v62 = vpop.xlane.xlu1 %2330 }
 0xdf3   :  { %v2374_v63 = vrot.slane %v2331_v62, %v2345_v44  ;;  %v2386_v1 = vsel %vm2385_vm7, %v2370_v61, %v2384_v60 }
 0xdf5   :  { %v2388_v2 = vsel %vm2387_vm8, %v2374_v63, %v2386_v1 }
 0xdf6   :  { %v2390_v3 = vsel %vm2334_vm9, %v2388_v2, -1e+30 }
 0xdf7   :  { %v2392_v4 = vsel %vm2391_vm10, %v2390_v3, -inf }
 0xdf8   :  { %2393 = vmax.xlane.f32.xlu0 %v2392_v4 }
 0xe85   :  { %v2394_v5 = vpop.xlane.xlu0 %2393 }
 0xe86   :  { %v2395_v7 = vsub.f32 %v2390_v3, %v2394_v5 }
 0xe88   :  { %v2396_v8 = vmul.f32 1.442695, %v2395_v7 }
 0xe8a   :  { %3700 = vpow2.f32 %v2396_v8 }
 0xe94   :  { %v3701_v10 = vpop.eup %3700 }
 0xe95   :  { %v2398_v11 = vsel %vm2391_vm10, %v3701_v10, 0.0 }
 0xe96   :  { %2399 = vadd.xlane.f32.xlu1 %v2398_v11 }
 0xf23   :  { %v2400_v14 = vpop.xlane.xlu1 %2399 }
 0xf24   :  { %3702 = vrcp.f32 %v2400_v14 }
 0xf2e   :  { %v3703_v15 = vpop.eup %3702 }
 0xf2f   :  { %v2402_v17 = vmul.f32 %v3703_v15, %v3701_v10 }
 0xf31   :  { %3478 = vmatmul.mubr.msk.f32.vlgmr.msra.gmra.mrb[38].mxu0 %vm2391_vm10, %v2402_v17 }
 0xf32   :  { %3481 = vmatpush3.bf16.msra.mxu0 %v3692_v16  ;;  %3496 = vmatprep.mubr.msk.bf16.mxu0 %vm4268_vm0, %v4267_v0 }
 0xf33   :  { %3482 = vmatprep.subr.bf16.mxu0 %v4267_v0 }
 0xf36   :  { %3483 = vmatpush3.bf16.msra.mxu0 %v3693_v18 }
 0xf37   :  { %3484 = vmatprep.subr.bf16.mxu0 %v4267_v0 }
 0xf3a   :  { %3485 = vmatpush3.bf16.msra.mxu0 %v3694_v19 }
 0xf3b   :  { %3486 = vmatprep.subr.bf16.mxu0 %v4267_v0 }
 0xf3e   :  { %3487 = vmatpush3.bf16.msra.mxu0 %v3695_v20 }
 0xf3f   :  { %3488 = vmatprep.subr.bf16.mxu0 %v4267_v0 }
 0xf42   :  { %3489 = vmatpush3.bf16.msra.mxu0 %v3696_v21 }
 0xf43   :  { %3490 = vmatprep.subr.bf16.mxu0 %v4267_v0 }
 0xf46   :  { %3491 = vmatpush3.bf16.msra.mxu0 %v3697_v22 }
 0xf47   :  { %3492 = vmatprep.subr.bf16.mxu0 %v4267_v0 }
 0xf4a   :  { %3493 = vmatpush3.bf16.msra.mxu0 %v3698_v23 }
 0xf4b   :  { %3494 = vmatprep.subr.bf16.mxu0 %v4267_v0 }
 0xf4e   :  { %3495 = vmatpush3.bf16.msra.mxu0 %v3699_v24 }
 0xf51   :  { %3497 = vmatmul.mubr.bf16.vlgmr.msra.gmra.mrb[64].mxu0 %v2493_v25 }
0x1004   :  { %v2473_v26 = vpop.f32.mrb[38].mxu0 }
0x1005   :  { %v3479_v27 = vpop.f32.mrb[39].mxu0 }
0x1024   :  { %v2583_v28 = vpop.f32.mrb[64].mxu0 }
0x1025   :  { %v2584_v29 = vadd.f32 %v4918_v39, %v2583_v28  ;;  %v3498_v30 = vpop.f32.mrb[65].mxu0 }
0x1026   :  { %v2586_v33 = vpop.f32.mrb[66].mxu0 }
0x1027   :  { %v2589_v34 = vadd.f32 %v2584_v29, %v2473_v26  ;;  %v3499_v46 = vpop.f32.mrb[67].mxu0 }
0x1029   :  { %2590 = vst [vmem:[%s4423_s12] sm:$0xff] %v2589_v34 }
0x102a   :  { %2722 = vsyncpa [#allocation3], 1 }
0x102b   :  { %2723 = vsyncpa [#allocation5], 1 }
0x102c   :  { %2724 = vsyncpa [#allocation8], 1 }
0x102d   :  { %2725 = vsyncpa [#allocation11], 1 }
0x102e   :  { %2726 = vsyncpa [#allocation14], 1 }
0x102f   :  { %2727 = vsyncpa [#allocation17], 1 }
0x1030   :  { %2728 = vsyncpa [#allocation20], 1 }
0x1031   :  { %2729 = vsyncpa [#allocation23], 1 }
0x1032   :  { %2730 = vsyncpa [#allocation26], 1 }
0x1033   :  { %2731 = vsyncpa [#allocation29], 1 }
0x1034   :  { %2732 = vsyncpa [#allocation32], 1 }
0x1035   :  { %2733 = vsyncpa [#allocation35], 1 }

</bundles_post_ra>
